<compile_context>
chip_gen: v6e
topology: v6e:2x2x1
jax: 0.10.0
libtpu: 0.0.40
codegen_flags: <defaults>
</compile_context>

<pallas_src>
import functools
import math

import jax
import jax.numpy as jnp
from jax.experimental import pallas as pl
from jax.experimental.pallas import tpu as pltpu

LANE = 128
M_ALIGN = 256           # MXU M dim (v6e/v7x 256x256); multiple of bf16 sublane tile (16).
BF, F4 = 2, 4           # bytes per bf16 / f32 element


def _round_up(n, m):
    return ((n + m - 1) // m) * m


def _cdiv(a, b):
    return -(-a // b)


def _vmem_capacity_bytes():
    try:
        info = pltpu.get_tpu_info()
        cap = getattr(info, "vmem_capacity_bytes", None)
        if cap:
            return int(cap)
    except Exception:
        pass
    return 64 * 1024 * 1024          # conservative default (v7x per-TC VMEM)


def _bspec(shape, index_map, *, buffers=None):
    """BlockSpec with optional explicit buffer count.  Buffered(1) keeps a
    grid-invariant operand single-buffered instead of the default two."""
    if buffers is None:
        return pl.BlockSpec(shape, index_map)
    try:
        return pl.BlockSpec(shape, index_map, pipeline_mode=pl.Buffered(buffers))
    except TypeError:                 # older BlockSpec signature: fall back cleanly
        return pl.BlockSpec(shape, index_map)


# ----------------------------- Pallas kernel ------------------------------- #

def layer_kernel(x_ref, wa_ref, ba_ref, w2_ref, b2_ref, w3_ref, b3_ref,
                 W1_ref, B1_ref, W2_ref, B2_ref, W3_ref, B3_ref,
                 out_ref, acc_ref, res_ref, inb_ref, *, stack_resident):
    """grid = (row tiles, stacked blocks).  The block axis is sequential: the
    (tm, C) activation lives in VMEM scratch while the stacked-block weights
    are either fully VMEM-resident (indexed by `i`) or streamed per step."""
    i = pl.program_id(1)
    p_p = w2_ref.shape[0]                       # padded `planes` (static)

    def mm_bias_relu(a_bf16, w, b):
        # bf16 MXU matmul with f32 accumulation; bias-add + relu in f32.
        h = jnp.dot(a_bf16, w, preferred_element_type=jnp.float32)
        return jnp.maximum(h + b, 0.0)

    @pl.when(i == 0)
    def _():
        # Stage A: block1(x) and the residual branch.  The two x-consuming
        # matmuls (block1.conv1 and the 1x1 resblock) are fused via the
        # column-concatenated weight `wa`.
        ha = jnp.dot(x_ref[...], wa_ref[...], preferred_element_type=jnp.float32)
        ha = jnp.maximum(ha + ba_ref[...], 0.0)
        h1 = ha[:, :p_p]                        # relu(bn1(conv1(x)))
        r = ha[:, p_p:]                         # relu(res_bn(resblock(x)))
        h = mm_bias_relu(h1.astype(jnp.bfloat16), w2_ref[...], b2_ref[...])
        o = mm_bias_relu(h.astype(jnp.bfloat16), w3_ref[...], b3_ref[...])
        o = o + r                               # out += residual
        # NOTE: the residual is frozen here (written exactly once), matching
        # the reference module -- it must NOT be updated in later iterations.
        res_ref[...] = o
        inb_ref[...] = o.astype(jnp.bfloat16)   # bf16 input to block2

    @pl.when(i > 0)
    def _():
        # Repeat section: out += residual before every block after block2.
        # One f32 read of acc/res, cast once to bf16 for the W1 matmul.
        inb_ref[...] = (acc_ref[...] + res_ref[...]).astype(jnp.bfloat16)

    if stack_resident:
        W1, B1 = W1_ref[i], B1_ref[i]
        W2, B2 = W2_ref[i], B2_ref[i]
        W3, B3 = W3_ref[i], B3_ref[i]
    else:
        W1, B1 = W1_ref[...], B1_ref[...]
        W2, B2 = W2_ref[...], B2_ref[...]
        W3, B3 = W3_ref[...], B3_ref[...]

    # apply stacked block i (i == 0: block2; i > 0: repeat blocks)
    h = mm_bias_relu(inb_ref[...], W1, B1)
    h = mm_bias_relu(h.astype(jnp.bfloat16), W2, B2)
    o = mm_bias_relu(h.astype(jnp.bfloat16), W3, B3)
    acc_ref[...] = o                            # f32 block output (for next residual add)

    @pl.when(i == pl.num_programs(1) - 1)
    def _():
        # TODO(synk): bf16 output (v5e writeback saving) if the consumer allows it.
        out_ref[...] = o.astype(out_ref.dtype)


# ------------------------------ JAX wrapper -------------------------------- #

def layer_forward(x_nchw, params, *, stride, tm=None):
    """x_nchw: (N, Cin, H, W) float32.  Returns (N, 4*planes, Ho, Wo) float32."""
    N, Cin, H, W = x_nchw.shape
    planes = params["b1"]["w1"].shape[1]
    cout = 4 * planes
    NB = params["W1s"].shape[0]                 # 1 (block2) + repeat

    # 1x1 convs commute with spatial subsampling -> subsample once up front.
    xs = x_nchw[:, :, ::stride, ::stride]
    Ho, Wo = xs.shape[2], xs.shape[3]
    xs = jnp.transpose(xs, (0, 2, 3, 1)).reshape(N * Ho * Wo, Cin)
    M = xs.shape[0]

    # Lane-dense padding of all channel dims (zero pads are exact: zero weight
    # columns/rows + zero bias keep padded lanes at 0 through every relu).
    cin_p = _round_up(Cin, LANE)
    p_p = _round_up(planes, LANE)
    c4_p = _round_up(cout, LANE)

    # ---------------- VMEM budgeting / tile-size selection ---------------- #
    stage_a_bytes = ((cin_p * (p_p + c4_p) + p_p * p_p + p_p * c4_p) * BF
                     + 2 * (p_p + c4_p) * F4)                       # Buffered(1): 1 copy
    per_block_w = (c4_p * p_p + p_p * p_p + p_p * c4_p) * BF + (2 * p_p + c4_p) * F4
    stack_bytes = NB * per_block_w

    vmem_cap = _vmem_capacity_bytes()
    budget = min(vmem_cap * 3 // 4, 100 * 1024 * 1024)   # ~48 MiB on v7x, ~96 MiB on v5e/v6e

    def vmem_need(tm_, resident):
        tiles = 2 * tm_ * cin_p * BF + 2 * tm_ * c4_p * F4          # 2-buffered x / out tiles
        scratch = tm_ * c4_p * (F4 + F4 + BF)                       # acc + residual + bf16 input
        wbytes = stack_bytes if resident else 2 * per_block_w       # resident vs streamed(2-buf)
        return tiles + scratch + stage_a_bytes + wbytes

    if tm is None:
        tm = 2048 if planes <= 256 else 1024        # large tile -> MXU-bound inner step
    tm = max(M_ALIGN, _round_up(tm, M_ALIGN))
    tm = min(tm, _round_up(M, M_ALIGN))

    # Keep the whole stacked-weight stack VMEM-resident (single HBM read) when
    # it fits the budget; otherwise stream one block per grid step.
    stack_resident = vmem_need(M_ALIGN, True) <= budget
    while vmem_need(tm, stack_resident) > budget and tm > M_ALIGN:
        tm -= M_ALIGN

    # Prefer an even number of M steps (v7x shards the parallel axis over 2 TCs).
    n_m = _cdiv(M, tm)
    if n_m > 1 and n_m % 2 == 1:
        tm_even = _round_up(_cdiv(M, n_m + 1), M_ALIGN)
        if (tm_even >= M_ALIGN and _cdiv(M, tm_even) % 2 == 0
                and vmem_need(tm_even, stack_resident) <= budget):
            tm = tm_even
    m_p = _round_up(M, tm)
    n_m = m_p // tm

    # -------------------- parameter folding / padding --------------------- #
    def pad2(a, r, c):
        return jnp.pad(a, ((0, r - a.shape[0]), (0, c - a.shape[1])))

    def pad3(a, r, c):
        return jnp.pad(a, ((0, 0), (0, r - a.shape[1]), (0, c - a.shape[2])))

    b1p = params["b1"]
    # Fold BN (eval-mode) scale into weight columns, pad, cast matmul operands to bf16.
    w1 = pad2(b1p["w1"] * b1p["s1"], cin_p, p_p)
    wr = pad2(params["wr"] * params["sr"], cin_p, c4_p)
    wa = jnp.concatenate([w1, wr], axis=1).astype(jnp.bfloat16)
    ba = jnp.concatenate([pad2(b1p["b1"], 1, p_p), pad2(params["br"], 1, c4_p)],
                         axis=1).astype(jnp.float32)
    w2 = pad2(b1p["w2"] * b1p["s2"], p_p, p_p).astype(jnp.bfloat16)
    b2 = pad2(b1p["b2"], 1, p_p).astype(jnp.float32)
    w3 = pad2(b1p["w3"] * b1p["s3"], p_p, c4_p).astype(jnp.bfloat16)
    b3 = pad2(b1p["b3"], 1, c4_p).astype(jnp.float32)

    W1 = pad3(params["W1s"] * params["S1s"], c4_p, p_p).astype(jnp.bfloat16)
    B1 = pad3(params["B1s"], 1, p_p).astype(jnp.float32)
    W2 = pad3(params["W2s"] * params["S2s"], p_p, p_p).astype(jnp.bfloat16)
    B2 = pad3(params["B2s"], 1, p_p).astype(jnp.float32)
    W3 = pad3(params["W3s"] * params["S3s"], p_p, c4_p).astype(jnp.bfloat16)
    B3 = pad3(params["B3s"], 1, c4_p).astype(jnp.float32)

    xpad = jnp.pad(xs, ((0, m_p - M), (0, cin_p - Cin))).astype(jnp.bfloat16)

    # ------------------------------- specs --------------------------------- #
    const2 = lambda m, i: (0, 0)
    const3 = lambda m, i: (0, 0, 0)
    in_specs = [
        pl.BlockSpec((tm, cin_p), lambda m, i: (m, 0)),            # x tile
        _bspec(wa.shape, const2, buffers=1),                       # stage-A (grid-invariant)
        _bspec(ba.shape, const2, buffers=1),
        _bspec(w2.shape, const2, buffers=1),
        _bspec(b2.shape, const2, buffers=1),
        _bspec(w3.shape, const2, buffers=1),
        _bspec(b3.shape, const2, buffers=1),
    ]
    if stack_resident:
        in_specs += [
            _bspec((NB, c4_p, p_p), const3, buffers=1),            # whole stack resident
            _bspec((NB, 1, p_p), const3, buffers=1),
            _bspec((NB, p_p, p_p), const3, buffers=1),
            _bspec((NB, 1, p_p), const3, buffers=1),
            _bspec((NB, p_p, c4_p), const3, buffers=1),
            _bspec((NB, 1, c4_p), const3, buffers=1),
        ]
    else:
        stream = lambda m, i: (i, 0, 0)
        in_specs += [
            pl.BlockSpec((None, c4_p, p_p), stream),               # streamed, 2-buffered
            pl.BlockSpec((None, 1, p_p), stream),
            pl.BlockSpec((None, p_p, p_p), stream),
            pl.BlockSpec((None, 1, p_p), stream),
            pl.BlockSpec((None, p_p, c4_p), stream),
            pl.BlockSpec((None, 1, c4_p), stream),
        ]

    need = vmem_need(tm, stack_resident)
    vmem_limit = int(min(max(need + need // 4 + (2 << 20), 16 << 20),
                         vmem_cap - (8 << 20)))

    flops = (2 * m_p * (cin_p * (p_p + c4_p) + p_p * p_p + p_p * c4_p)
             + 2 * m_p * NB * (c4_p * p_p + p_p * p_p + p_p * c4_p))
    stack_reads = stack_bytes * (1 if stack_resident else n_m)     # re-streamed per m-tile
    bytes_accessed = xpad.size * BF + m_p * c4_p * F4 + stage_a_bytes + stack_reads
    cost = pl.CostEstimate(flops=int(flops), transcendentals=0,
                           bytes_accessed=int(bytes_accessed))

    out_flat = pl.pallas_call(
        functools.partial(layer_kernel, stack_resident=stack_resident),
        out_shape=jax.ShapeDtypeStruct((m_p, c4_p), jnp.float32),
        grid_spec=pltpu.PrefetchScalarGridSpec(
            num_scalar_prefetch=0,
            grid=(n_m, NB),
            in_specs=in_specs,
            out_specs=pl.BlockSpec((tm, c4_p), lambda m, i: (m, 0)),
            scratch_shapes=[pltpu.VMEM((tm, c4_p), jnp.float32),    # acc (f32 block output)
                            pltpu.VMEM((tm, c4_p), jnp.float32),    # residual (frozen at i==0)
                            pltpu.VMEM((tm, c4_p), jnp.bfloat16)],  # bf16 block input
        ),
        compiler_params=pltpu.CompilerParams(
            dimension_semantics=("parallel", "arbitrary"),
            vmem_limit_bytes=vmem_limit),
        cost_estimate=cost,
    )(xpad, wa, ba, w2, b2, w3, b3, W1, B1, W2, B2, W3, B3)

    out = out_flat[:M, :cout].reshape(N, Ho, Wo, cout).transpose(0, 3, 1, 2)
    return out


# --------------------------- parameter creation ----------------------------- #

def _bn_fold(key, c):
    k1, k2, k3, k4 = jax.random.split(key, 4)
    gamma = jax.random.uniform(k1, (c,), minval=0.5, maxval=1.5)
    beta = 0.1 * jax.random.normal(k2, (c,))
    mean = 0.1 * jax.random.normal(k3, (c,))
    var = jax.random.uniform(k4, (c,), minval=0.5, maxval=1.5)
    scale = gamma / jnp.sqrt(var + 1e-5)
    shift = beta - mean * scale
    return (scale.reshape(1, c).astype(jnp.float32),
            shift.reshape(1, c).astype(jnp.float32))


def _init_block(key, cin, planes):
    ks = jax.random.split(key, 6)
    w1 = (jax.random.normal(ks[0], (cin, planes)) / math.sqrt(cin)).astype(jnp.float32)
    s1, b1 = _bn_fold(ks[1], planes)
    w2 = (jax.random.normal(ks[2], (planes, planes)) / math.sqrt(planes)).astype(jnp.float32)
    s2, b2 = _bn_fold(ks[3], planes)
    w3 = (jax.random.normal(ks[4], (planes, 4 * planes)) / math.sqrt(planes)).astype(jnp.float32)
    s3, b3 = _bn_fold(ks[5], 4 * planes)
    return dict(w1=w1, s1=s1, b1=b1, w2=w2, s2=s2, b2=b2, w3=w3, s3=s3, b3=b3)


def init_layer_params(key, inplanes, planes, repeat, res_factor):
    assert inplanes * res_factor == 4 * planes, "residual add requires matching channels"
    k_b1, k_res, k_stack = jax.random.split(key, 3)
    b1 = _init_block(k_b1, inplanes, planes)

    kr1, kr2 = jax.random.split(k_res)
    cr = inplanes * res_factor
    wr = (jax.random.normal(kr1, (inplanes, cr)) / math.sqrt(inplanes)).astype(jnp.float32)
    sr, br = _bn_fold(kr2, cr)

    stack_keys = jax.random.split(k_stack, 1 + repeat)  # block2 + repeat blocks
    blocks = [_init_block(k, 4 * planes, planes) for k in stack_keys]
    stacked = {f"{n.upper()}s": jnp.stack([b[n] for b in blocks], axis=0)
               for n in ("w1", "s1", "b1", "w2", "s2", "b2", "w3", "s3", "b3")}

    return dict(b1=b1, wr=wr, sr=sr, br=br, **stacked)


# --------------- JAX reference (same bf16/f32 precision policy) -------------- #

def _fold_bf16(w, s):
    return (w * s).astype(jnp.bfloat16)


def _block_ref(x, w1, s1, b1, w2, s2, b2, w3, s3, b3):
    h = jnp.maximum(jnp.dot(x.astype(jnp.bfloat16), _fold_bf16(w1, s1),
                            preferred_element_type=jnp.float32) + b1, 0.0)
    h = jnp.maximum(jnp.dot(h.astype(jnp.bfloat16), _fold_bf16(w2, s2),
                            preferred_element_type=jnp.float32) + b2, 0.0)
    h = jnp.maximum(jnp.dot(h.astype(jnp.bfloat16), _fold_bf16(w3, s3),
                            preferred_element_type=jnp.float32) + b3, 0.0)
    return h


def layer_forward_ref(x_nchw, params, *, stride):
    N, Cin, H, W = x_nchw.shape
    xs = x_nchw[:, :, ::stride, ::stride]
    Ho, Wo = xs.shape[2], xs.shape[3]
    xs = jnp.transpose(xs, (0, 2, 3, 1)).reshape(N * Ho * Wo, Cin)

    b1 = params["b1"]
    out = _block_ref(xs, b1["w1"], b1["s1"], b1["b1"],
                     b1["w2"], b1["s2"], b1["b2"],
                     b1["w3"], b1["s3"], b1["b3"])
    r = jnp.maximum(jnp.dot(xs.astype(jnp.bfloat16),
                            _fold_bf16(params["wr"], params["sr"]),
                            preferred_element_type=jnp.float32) + params["br"], 0.0)
    out = out + r
    residual = out
    nblocks = params["W1s"].shape[0]
    for i in range(nblocks):
        if i > 0:
            out = out + residual
        out = _block_ref(out,
                         params["W1s"][i], params["S1s"][i], params["B1s"][i],
                         params["W2s"][i], params["S2s"][i], params["B2s"][i],
                         params["W3s"][i], params["S3s"][i], params["B3s"][i])
    cout = params["W3s"].shape[-1]
    return out.reshape(N, Ho, Wo, cout).transpose(0, 3, 1, 2)


# ---------------------------------- main ------------------------------------ #

if __name__ == "__main__":
    # Small shapes consistent with the module's forward.
    N, inplanes, H, W = 2, 8, 16, 16
    planes, stride, repeat = 8, 2, 2
    res_factor = (4 * planes) // inplanes  # residual add requires 4*planes channels

    key = jax.random.PRNGKey(0)
    kx, kp = jax.random.split(key)
    x = jax.random.normal(kx, (N, inplanes, H, W), dtype=jnp.float32)
    params = init_layer_params(kp, inplanes, planes, repeat, res_factor)

    out = jax.block_until_ready(layer_forward(x, params, stride=stride))
    ref = jax.block_until_ready(layer_forward_ref(x, params, stride=stride))

    assert out.shape == (N, 4 * planes, H // stride, W // stride), out.shape
    max_err = float(jnp.max(jnp.abs(out - ref)))
    assert jnp.allclose(out, ref, rtol=1e-2, atol=1e-2), max_err

    print("KERNEL_OK")
</pallas_src>

<mosaic_0001>
module attributes {stable_mosaic.version = 11 : i64} {
  func.func @layer_kernel(%arg0: i32, %arg1: i32, %arg2: memref<256x128xbf16, #tpu.memory_space<vmem>>, %arg3: memref<128x256xbf16, #tpu.memory_space<vmem>>, %arg4: memref<1x256xf32, #tpu.memory_space<vmem>>, %arg5: memref<128x128xbf16, #tpu.memory_space<vmem>>, %arg6: memref<1x128xf32, #tpu.memory_space<vmem>>, %arg7: memref<128x128xbf16, #tpu.memory_space<vmem>>, %arg8: memref<1x128xf32, #tpu.memory_space<vmem>>, %arg9: memref<3x128x128xbf16, #tpu.memory_space<vmem>>, %arg10: memref<3x1x128xf32, #tpu.memory_space<vmem>>, %arg11: memref<3x128x128xbf16, #tpu.memory_space<vmem>>, %arg12: memref<3x1x128xf32, #tpu.memory_space<vmem>>, %arg13: memref<3x128x128xbf16, #tpu.memory_space<vmem>>, %arg14: memref<3x1x128xf32, #tpu.memory_space<vmem>>, %arg15: memref<256x128xf32, #tpu.memory_space<vmem>>, %arg16: memref<256x128xf32, #tpu.memory_space<vmem>>, %arg17: memref<256x128xf32, #tpu.memory_space<vmem>>, %arg18: memref<256x128xbf16, #tpu.memory_space<vmem>>) attributes {dimension_semantics = [#tpu.dimension_semantics<parallel>, #tpu.dimension_semantics<arbitrary>], iteration_bounds = array<i64: 1, 3>, scalar_prefetch = 0 : i64, scratch_operands = 3 : i64, tpu.core_type = #tpu.core_type<tc>, window_params = [{transform_indices = @transform_0, window_bounds = array<i64: 256, 128>}, {pipeline_mode = #tpu.pipeline_mode<synchronous>, transform_indices = @transform_1, window_bounds = array<i64: 128, 256>}, {pipeline_mode = #tpu.pipeline_mode<synchronous>, transform_indices = @transform_2, window_bounds = array<i64: 1, 256>}, {pipeline_mode = #tpu.pipeline_mode<synchronous>, transform_indices = @transform_3, window_bounds = array<i64: 128, 128>}, {pipeline_mode = #tpu.pipeline_mode<synchronous>, transform_indices = @transform_4, window_bounds = array<i64: 1, 128>}, {pipeline_mode = #tpu.pipeline_mode<synchronous>, transform_indices = @transform_5, window_bounds = array<i64: 128, 128>}, {pipeline_mode = #tpu.pipeline_mode<synchronous>, transform_indices = @transform_6, window_bounds = array<i64: 1, 128>}, {pipeline_mode = #tpu.pipeline_mode<synchronous>, transform_indices = @transform_7, window_bounds = array<i64: 3, 128, 128>}, {pipeline_mode = #tpu.pipeline_mode<synchronous>, transform_indices = @transform_8, window_bounds = array<i64: 3, 1, 128>}, {pipeline_mode = #tpu.pipeline_mode<synchronous>, transform_indices = @transform_9, window_bounds = array<i64: 3, 128, 128>}, {pipeline_mode = #tpu.pipeline_mode<synchronous>, transform_indices = @transform_10, window_bounds = array<i64: 3, 1, 128>}, {pipeline_mode = #tpu.pipeline_mode<synchronous>, transform_indices = @transform_11, window_bounds = array<i64: 3, 128, 128>}, {pipeline_mode = #tpu.pipeline_mode<synchronous>, transform_indices = @transform_12, window_bounds = array<i64: 3, 1, 128>}, {transform_indices = @transform_13, window_bounds = array<i64: 256, 128>}]} {
    %c0_i32 = arith.constant 0 : i32
    %0 = arith.cmpi eq, %arg1, %c0_i32 : i32
    %1 = arith.extui %0 : i1 to i32
    %c0_i32_0 = arith.constant 0 : i32
    %2 = arith.cmpi ne, %1, %c0_i32_0 : i32
    scf.if %2 {
      %c0_24 = arith.constant 0 : index
      %c0_25 = arith.constant 0 : index
      %46 = vector.load %arg2[%c0_24, %c0_25] : memref<256x128xbf16, #tpu.memory_space<vmem>>, vector<256x128xbf16>
      %c0_26 = arith.constant 0 : index
      %c0_27 = arith.constant 0 : index
      %47 = vector.load %arg3[%c0_26, %c0_27] : memref<128x256xbf16, #tpu.memory_space<vmem>>, vector<128x256xbf16>
      %cst_28 = arith.constant dense<0.000000e+00> : vector<256x256xf32>
      %48 = tpu.matmul %46, %47, %cst_28 {dimension_numbers = #tpu.dot_dimension_numbers<[1], [0], [0], [1], [0, 0, 1, 1], [], []>} : vector<256x128xbf16>, vector<128x256xbf16>, vector<256x256xf32> -> vector<256x256xf32>
      %c0_29 = arith.constant 0 : index
      %c0_30 = arith.constant 0 : index
      %49 = vector.load %arg4[%c0_29, %c0_30] : memref<1x256xf32, #tpu.memory_space<vmem>>, vector<1x256xf32>
      %50 = vector.broadcast %49 : vector<1x256xf32> to vector<256x256xf32>
      %51 = arith.addf %48, %50 : vector<256x256xf32>
      %cst_31 = arith.constant 0.000000e+00 : f32
      %52 = vector.broadcast %cst_31 : f32 to vector<256x256xf32>
      %53 = arith.maximumf %51, %52 : vector<256x256xf32>
      %54 = vector.extract_strided_slice %53 {offsets = [0, 0], sizes = [256, 128], strides = [1, 1]} : vector<256x256xf32> to vector<256x128xf32>
      %55 = vector.extract_strided_slice %53 {offsets = [0, 128], sizes = [256, 128], strides = [1, 1]} : vector<256x256xf32> to vector<256x128xf32>
      %56 = arith.truncf %54 : vector<256x128xf32> to vector<256x128xbf16>
      %c0_32 = arith.constant 0 : index
      %c0_33 = arith.constant 0 : index
      %57 = vector.load %arg5[%c0_32, %c0_33] : memref<128x128xbf16, #tpu.memory_space<vmem>>, vector<128x128xbf16>
      %c0_34 = arith.constant 0 : index
      %c0_35 = arith.constant 0 : index
      %58 = vector.load %arg6[%c0_34, %c0_35] : memref<1x128xf32, #tpu.memory_space<vmem>>, vector<1x128xf32>
      %cst_36 = arith.constant dense<0.000000e+00> : vector<256x128xf32>
      %59 = tpu.matmul %56, %57, %cst_36 {dimension_numbers = #tpu.dot_dimension_numbers<[1], [0], [0], [1], [0, 0, 1, 1], [], []>} : vector<256x128xbf16>, vector<128x128xbf16>, vector<256x128xf32> -> vector<256x128xf32>
      %60 = vector.broadcast %58 : vector<1x128xf32> to vector<256x128xf32>
      %61 = arith.addf %59, %60 : vector<256x128xf32>
      %cst_37 = arith.constant 0.000000e+00 : f32
      %62 = vector.broadcast %cst_37 : f32 to vector<256x128xf32>
      %63 = arith.maximumf %61, %62 : vector<256x128xf32>
      %64 = arith.truncf %63 : vector<256x128xf32> to vector<256x128xbf16>
      %c0_38 = arith.constant 0 : index
      %c0_39 = arith.constant 0 : index
      %65 = vector.load %arg7[%c0_38, %c0_39] : memref<128x128xbf16, #tpu.memory_space<vmem>>, vector<128x128xbf16>
      %c0_40 = arith.constant 0 : index
      %c0_41 = arith.constant 0 : index
      %66 = vector.load %arg8[%c0_40, %c0_41] : memref<1x128xf32, #tpu.memory_space<vmem>>, vector<1x128xf32>
      %cst_42 = arith.constant dense<0.000000e+00> : vector<256x128xf32>
      %67 = tpu.matmul %64, %65, %cst_42 {dimension_numbers = #tpu.dot_dimension_numbers<[1], [0], [0], [1], [0, 0, 1, 1], [], []>} : vector<256x128xbf16>, vector<128x128xbf16>, vector<256x128xf32> -> vector<256x128xf32>
      %68 = vector.broadcast %66 : vector<1x128xf32> to vector<256x128xf32>
      %69 = arith.addf %67, %68 : vector<256x128xf32>
      %cst_43 = arith.constant 0.000000e+00 : f32
      %70 = vector.broadcast %cst_43 : f32 to vector<256x128xf32>
      %71 = arith.maximumf %69, %70 : vector<256x128xf32>
      %72 = arith.addf %71, %55 : vector<256x128xf32>
      %c0_44 = arith.constant 0 : index
      %c0_45 = arith.constant 0 : index
      %73 = vector.load %arg17[%c0_44, %c0_45] : memref<256x128xf32, #tpu.memory_space<vmem>>, vector<256x128xf32>
      tpu.vector_store %arg17[%c0_44, %c0_45], %72 {strides = array<i32>} : memref<256x128xf32, #tpu.memory_space<vmem>>, vector<256x128xf32>,
      %74 = arith.truncf %72 : vector<256x128xf32> to vector<256x128xbf16>
      %c0_46 = arith.constant 0 : index
      %c0_47 = arith.constant 0 : index
      %75 = vector.load %arg18[%c0_46, %c0_47] : memref<256x128xbf16, #tpu.memory_space<vmem>>, vector<256x128xbf16>
      tpu.vector_store %arg18[%c0_46, %c0_47], %74 {strides = array<i32>} : memref<256x128xbf16, #tpu.memory_space<vmem>>, vector<256x128xbf16>,
    } else {
    }
    %c0_i32_1 = arith.constant 0 : i32
    %3 = arith.cmpi sgt, %arg1, %c0_i32_1 : i32
    %4 = arith.extui %3 : i1 to i32
    %c0_i32_2 = arith.constant 0 : i32
    %5 = arith.cmpi ne, %4, %c0_i32_2 : i32
    scf.if %5 {
      %c0_24 = arith.constant 0 : index
      %c0_25 = arith.constant 0 : index
      %46 = vector.load %arg16[%c0_24, %c0_25] : memref<256x128xf32, #tpu.memory_space<vmem>>, vector<256x128xf32>
      %c0_26 = arith.constant 0 : index
      %c0_27 = arith.constant 0 : index
      %47 = vector.load %arg17[%c0_26, %c0_27] : memref<256x128xf32, #tpu.memory_space<vmem>>, vector<256x128xf32>
      %48 = arith.addf %46, %47 : vector<256x128xf32>
      %49 = arith.truncf %48 : vector<256x128xf32> to vector<256x128xbf16>
      %c0_28 = arith.constant 0 : index
      %c0_29 = arith.constant 0 : index
      %50 = vector.load %arg18[%c0_28, %c0_29] : memref<256x128xbf16, #tpu.memory_space<vmem>>, vector<256x128xbf16>
      tpu.vector_store %arg18[%c0_28, %c0_29], %49 {strides = array<i32>} : memref<256x128xbf16, #tpu.memory_space<vmem>>, vector<256x128xbf16>,
    } else {
    }
    %6 = arith.index_cast %arg1 : i32 to index
    %c0 = arith.constant 0 : index
    %c0_3 = arith.constant 0 : index
    %7 = vector.load %arg9[%6, %c0, %c0_3] : memref<3x128x128xbf16, #tpu.memory_space<vmem>>, vector<1x128x128xbf16>
    %8 = vector.shape_cast %7 : vector<1x128x128xbf16> to vector<128x128xbf16>
    %9 = arith.index_cast %arg1 : i32 to index
    %c0_4 = arith.constant 0 : index
    %c0_5 = arith.constant 0 : index
    %10 = vector.load %arg10[%9, %c0_4, %c0_5] : memref<3x1x128xf32, #tpu.memory_space<vmem>>, vector<1x1x128xf32>
    %11 = vector.shape_cast %10 : vector<1x1x128xf32> to vector<1x128xf32>
    %12 = arith.index_cast %arg1 : i32 to index
    %c0_6 = arith.constant 0 : index
    %c0_7 = arith.constant 0 : index
    %13 = vector.load %arg11[%12, %c0_6, %c0_7] : memref<3x128x128xbf16, #tpu.memory_space<vmem>>, vector<1x128x128xbf16>
    %14 = vector.shape_cast %13 : vector<1x128x128xbf16> to vector<128x128xbf16>
    %15 = arith.index_cast %arg1 : i32 to index
    %c0_8 = arith.constant 0 : index
    %c0_9 = arith.constant 0 : index
    %16 = vector.load %arg12[%15, %c0_8, %c0_9] : memref<3x1x128xf32, #tpu.memory_space<vmem>>, vector<1x1x128xf32>
    %17 = vector.shape_cast %16 : vector<1x1x128xf32> to vector<1x128xf32>
    %18 = arith.index_cast %arg1 : i32 to index
    %c0_10 = arith.constant 0 : index
    %c0_11 = arith.constant 0 : index
    %19 = vector.load %arg13[%18, %c0_10, %c0_11] : memref<3x128x128xbf16, #tpu.memory_space<vmem>>, vector<1x128x128xbf16>
    %20 = vector.shape_cast %19 : vector<1x128x128xbf16> to vector<128x128xbf16>
    %21 = arith.index_cast %arg1 : i32 to index
    %c0_12 = arith.constant 0 : index
    %c0_13 = arith.constant 0 : index
    %22 = vector.load %arg14[%21, %c0_12, %c0_13] : memref<3x1x128xf32, #tpu.memory_space<vmem>>, vector<1x1x128xf32>
    %23 = vector.shape_cast %22 : vector<1x1x128xf32> to vector<1x128xf32>
    %c0_14 = arith.constant 0 : index
    %c0_15 = arith.constant 0 : index
    %24 = vector.load %arg18[%c0_14, %c0_15] : memref<256x128xbf16, #tpu.memory_space<vmem>>, vector<256x128xbf16>
    %cst = arith.constant dense<0.000000e+00> : vector<256x128xf32>
    %25 = tpu.matmul %24, %8, %cst {dimension_numbers = #tpu.dot_dimension_numbers<[1], [0], [0], [1], [0, 0, 1, 1], [], []>} : vector<256x128xbf16>, vector<128x128xbf16>, vector<256x128xf32> -> vector<256x128xf32>
    %26 = vector.broadcast %11 : vector<1x128xf32> to vector<256x128xf32>
    %27 = arith.addf %25, %26 : vector<256x128xf32>
    %cst_16 = arith.constant 0.000000e+00 : f32
    %28 = vector.broadcast %cst_16 : f32 to vector<256x128xf32>
    %29 = arith.maximumf %27, %28 : vector<256x128xf32>
    %30 = arith.truncf %29 : vector<256x128xf32> to vector<256x128xbf16>
    %cst_17 = arith.constant dense<0.000000e+00> : vector<256x128xf32>
    %31 = tpu.matmul %30, %14, %cst_17 {dimension_numbers = #tpu.dot_dimension_numbers<[1], [0], [0], [1], [0, 0, 1, 1], [], []>} : vector<256x128xbf16>, vector<128x128xbf16>, vector<256x128xf32> -> vector<256x128xf32>
    %32 = vector.broadcast %17 : vector<1x128xf32> to vector<256x128xf32>
    %33 = arith.addf %31, %32 : vector<256x128xf32>
    %cst_18 = arith.constant 0.000000e+00 : f32
    %34 = vector.broadcast %cst_18 : f32 to vector<256x128xf32>
    %35 = arith.maximumf %33, %34 : vector<256x128xf32>
    %36 = arith.truncf %35 : vector<256x128xf32> to vector<256x128xbf16>
    %cst_19 = arith.constant dense<0.000000e+00> : vector<256x128xf32>
    %37 = tpu.matmul %36, %20, %cst_19 {dimension_numbers = #tpu.dot_dimension_numbers<[1], [0], [0], [1], [0, 0, 1, 1], [], []>} : vector<256x128xbf16>, vector<128x128xbf16>, vector<256x128xf32> -> vector<256x128xf32>
    %38 = vector.broadcast %23 : vector<1x128xf32> to vector<256x128xf32>
    %39 = arith.addf %37, %38 : vector<256x128xf32>
    %cst_20 = arith.constant 0.000000e+00 : f32
    %40 = vector.broadcast %cst_20 : f32 to vector<256x128xf32>
    %41 = arith.maximumf %39, %40 : vector<256x128xf32>
    %c0_21 = arith.constant 0 : index
    %c0_22 = arith.constant 0 : index
    %42 = vector.load %arg16[%c0_21, %c0_22] : memref<256x128xf32, #tpu.memory_space<vmem>>, vector<256x128xf32>
    tpu.vector_store %arg16[%c0_21, %c0_22], %41 {strides = array<i32>} : memref<256x128xf32, #tpu.memory_space<vmem>>, vector<256x128xf32>,
    %c2_i32 = arith.constant 2 : i32
    %43 = arith.cmpi eq, %arg1, %c2_i32 : i32
    %44 = arith.extui %43 : i1 to i32
    %c0_i32_23 = arith.constant 0 : i32
    %45 = arith.cmpi ne, %44, %c0_i32_23 : i32
    scf.if %45 {
      %c0_24 = arith.constant 0 : index
      %c0_25 = arith.constant 0 : index
      %46 = vector.load %arg15[%c0_24, %c0_25] : memref<256x128xf32, #tpu.memory_space<vmem>>, vector<256x128xf32>
      tpu.vector_store %arg15[%c0_24, %c0_25], %41 {strides = array<i32>} : memref<256x128xf32, #tpu.memory_space<vmem>>, vector<256x128xf32>,
    } else {
    }
    return
  }
  func.func @transform_0(%arg0: i32, %arg1: i32) -> (i32, i32) {
    %c0_i32 = arith.constant 0 : i32
    %c0_i32_0 = arith.constant 0 : i32
    return %arg0, %c0_i32 : i32, i32
  }
  func.func @transform_1(%arg0: i32, %arg1: i32) -> (i32, i32) {
    %c0_i32 = arith.constant 0 : i32
    %c0_i32_0 = arith.constant 0 : i32
    %c0_i32_1 = arith.constant 0 : i32
    return %c0_i32, %c0_i32_0 : i32, i32
  }
  func.func @transform_2(%arg0: i32, %arg1: i32) -> (i32, i32) {
    %c0_i32 = arith.constant 0 : i32
    %c0_i32_0 = arith.constant 0 : i32
    %c0_i32_1 = arith.constant 0 : i32
    return %c0_i32, %c0_i32_0 : i32, i32
  }
  func.func @transform_3(%arg0: i32, %arg1: i32) -> (i32, i32) {
    %c0_i32 = arith.constant 0 : i32
    %c0_i32_0 = arith.constant 0 : i32
    %c0_i32_1 = arith.constant 0 : i32
    return %c0_i32, %c0_i32_0 : i32, i32
  }
  func.func @transform_4(%arg0: i32, %arg1: i32) -> (i32, i32) {
    %c0_i32 = arith.constant 0 : i32
    %c0_i32_0 = arith.constant 0 : i32
    %c0_i32_1 = arith.constant 0 : i32
    return %c0_i32, %c0_i32_0 : i32, i32
  }
  func.func @transform_5(%arg0: i32, %arg1: i32) -> (i32, i32) {
    %c0_i32 = arith.constant 0 : i32
    %c0_i32_0 = arith.constant 0 : i32
    %c0_i32_1 = arith.constant 0 : i32
    return %c0_i32, %c0_i32_0 : i32, i32
  }
  func.func @transform_6(%arg0: i32, %arg1: i32) -> (i32, i32) {
    %c0_i32 = arith.constant 0 : i32
    %c0_i32_0 = arith.constant 0 : i32
    %c0_i32_1 = arith.constant 0 : i32
    return %c0_i32, %c0_i32_0 : i32, i32
  }
  func.func @transform_7(%arg0: i32, %arg1: i32) -> (i32, i32, i32) {
    %c0_i32 = arith.constant 0 : i32
    %c0_i32_0 = arith.constant 0 : i32
    %c0_i32_1 = arith.constant 0 : i32
    %c0_i32_2 = arith.constant 0 : i32
    return %c0_i32, %c0_i32_0, %c0_i32_1 : i32, i32, i32
  }
  func.func @transform_8(%arg0: i32, %arg1: i32) -> (i32, i32, i32) {
    %c0_i32 = arith.constant 0 : i32
    %c0_i32_0 = arith.constant 0 : i32
    %c0_i32_1 = arith.constant 0 : i32
    %c0_i32_2 = arith.constant 0 : i32
    return %c0_i32, %c0_i32_0, %c0_i32_1 : i32, i32, i32
  }
  func.func @transform_9(%arg0: i32, %arg1: i32) -> (i32, i32, i32) {
    %c0_i32 = arith.constant 0 : i32
    %c0_i32_0 = arith.constant 0 : i32
    %c0_i32_1 = arith.constant 0 : i32
    %c0_i32_2 = arith.constant 0 : i32
    return %c0_i32, %c0_i32_0, %c0_i32_1 : i32, i32, i32
  }
  func.func @transform_10(%arg0: i32, %arg1: i32) -> (i32, i32, i32) {
    %c0_i32 = arith.constant 0 : i32
    %c0_i32_0 = arith.constant 0 : i32
    %c0_i32_1 = arith.constant 0 : i32
    %c0_i32_2 = arith.constant 0 : i32
    return %c0_i32, %c0_i32_0, %c0_i32_1 : i32, i32, i32
  }
  func.func @transform_11(%arg0: i32, %arg1: i32) -> (i32, i32, i32) {
    %c0_i32 = arith.constant 0 : i32
    %c0_i32_0 = arith.constant 0 : i32
    %c0_i32_1 = arith.constant 0 : i32
    %c0_i32_2 = arith.constant 0 : i32
    return %c0_i32, %c0_i32_0, %c0_i32_1 : i32, i32, i32
  }
  func.func @transform_12(%arg0: i32, %arg1: i32) -> (i32, i32, i32) {
    %c0_i32 = arith.constant 0 : i32
    %c0_i32_0 = arith.constant 0 : i32
    %c0_i32_1 = arith.constant 0 : i32
    %c0_i32_2 = arith.constant 0 : i32
    return %c0_i32, %c0_i32_0, %c0_i32_1 : i32, i32, i32
  }
  func.func @transform_13(%arg0: i32, %arg1: i32) -> (i32, i32) {
    %c0_i32 = arith.constant 0 : i32
    %c0_i32_0 = arith.constant 0 : i32
    return %arg0, %c0_i32 : i32, i32
  }
}

</mosaic_0001>

<bundles_post_ra>
// kernel: tpu_custom_call.1
= control target key start
LH: loop header
LB: loop body
LE: loop exit
PB: predicated region body
PF: predicated region fallthrough
CT: control target
= control target key end

     0   :  { %s5487_s0 = inlined_call_operand.hbm [shape: bf16[256,128], index: 0, kind: input, shape index: {}]   ;;  %s5488_s1 = inlined_call_operand.hbm [shape: bf16[128,256], index: 1, kind: input, shape index: {}]   ;;  %s5489_s2 = inlined_call_operand.hbm [shape: f32[1,256], index: 2, kind: input, shape index: {}]   ;;  %s5490_s3 = inlined_call_operand.hbm [shape: bf16[128,128], index: 3, kind: input, shape index: {}]   ;;  %s5491_s4 = inlined_call_operand.hbm [shape: f32[1,128], index: 4, kind: input, shape index: {}]   ;;  %s5492_s5 = inlined_call_operand.hbm [shape: bf16[128,128], index: 5, kind: input, shape index: {}]   ;;  %s5493_s6 = inlined_call_operand.vmem [shape: f32[1,128], index: 6, kind: input, shape index: {}]   ;;  %s5494_s7 = inlined_call_operand.hbm [shape: bf16[3,128,128], index: 7, kind: input, shape index: {}]   ;;  %s5495_s8 = inlined_call_operand.vmem [shape: f32[3,1,128], index: 8, kind: input, shape index: {}]   ;;  %s5496_s9 = inlined_call_operand.hbm [shape: bf16[3,128,128], index: 9, kind: input, shape index: {}]   ;;  %s5497_s10 = inlined_call_operand.vmem [shape: f32[3,1,128], index: 10, kind: input, shape index: {}]   ;;  %s5498_s11 = inlined_call_operand.hbm [shape: bf16[3,128,128], index: 11, kind: input, shape index: {}]   ;;  %s5499_s12 = inlined_call_operand.vmem [shape: f32[3,1,128], index: 12, kind: input, shape index: {}]   ;;  %s5500_s13 = inlined_call_operand.hbm [shape: f32[256,128], index: 13, kind: output, shape index: {}]  }
   0x1   :  { %5507 = sst [smem:[#allocation27_spill]] %s5488_s1 }
   0x2   :  { %18 = vsyncpa [#allocation6], 0 }
   0x3   :  { %19 = vsyncpa [#allocation9], 0 }
   0x4   :  { %20 = vsyncpa [#allocation12], 0 }
   0x5   :  { %21 = vsyncpa [#allocation15], 0 }
   0x6   :  { %22 = vsyncpa [#allocation18], 0 }
   0x7   :  { %23 = vsyncpa [#allocation7], 0  ;;  %s4722_s25 = smov 0   ;;  %s4724_s26 = smov 0  }
   0x8   :  { %s4726_s27 = smov 0  }
   0x9 LB: > { %s4635_s28 = smov [#allocation8]   ;;  %s5501_s30 = sadd.s32 4294967295, %s4633_s27   ;;  %s4633_s27 = sphi %s4726_s27, %s29_s27   ;;  %s4629_s26 = sphi %s4724_s26, %s5519_s26   ;;  %s4625_s25 = sphi %s4722_s25, %s5518_s25  }
   0xa   : > { %s378_s29 = sshll.u32 %s4635_s28, 4  ;;  %p3283_p0 = scmp.ge.s32.totalorder %s4633_s27, 1  ;;  %s379_s29 = int_to_ptr.vmem [resolvable:$true] %s378_s29 }
   0xb   : > { %p350_p1 = scmp.lt.s32.totalorder %s4633_s27, 4  ;;  %p4742_p2 = scmp.eq.s32.totalorder %s5501_s30, 0 }
   0xc   : > { %s4636_s17 = smov [#allocation11]   ;;  %s4637_s19 = smov [#allocation14]  }
   0xd   : > { %s5508_s14 = scalar_select %p4742_p2, 1, 0 }
   0xe   : > { %p4746_p3 = pnand %p3283_p0, %p350_p1  ;;  %s402_s18 = sshll.u32 %s4636_s17, 4  ;;  %s4758_s18 = int_to_ptr.vmem [resolvable:$true] %s402_s18 }
   0xf   : > { %s426_s20 = sshll.u32 %s4637_s19, 4  ;;  %s4340_s22 = scalar_lea.vmem %s379_s29, 2048  ;;  %s4760_s20 = int_to_ptr.vmem [resolvable:$true] %s426_s20 }
  0x10   : > { %s5509_s15 = scalar_select %p4746_p3, 1, 0 }
  0x11   : > { %p4144_p4 = pneg %p4746_p3  ;;  %p4341_p7 = scmp.ne.s32.totalorder %s379_s29, %s4340_s22 }
  0x12   : > { %p4348_p10 = scmp.lt.s32.totalorder %s379_s29, %s379_s29  ;;  %p4349_p11 = scmp.lt.s32.totalorder %s4340_s22, %s4340_s22 }
  0x13   : > { %p4754_p5 = pnand %p4742_p2, %p4144_p4 }
  0x14   : > { %p4350_p12 = por %p4349_p11, %p4348_p10 }
  0x15   : > { %p4764_p6 = pneg %p4754_p5 }
  0x17   : > { %p4343_p8 = pnand %p4341_p7, %p4764_p6 }
  0x19   : > { %p4344_p9 = pneg %p4343_p8 }
  0x1b   : > { %p4351_p13 = pnand %p4350_p12, %p4344_p9 }
  0x1d   : > { %4354 = shalt.err (!%p4351_p13)
}
  0x1e   : > { %s4638_s23 = smov 128   ;;  %s4639_s24 = smov 8  }
  0x1f   : > { %s5512_s1 = sld [smem:[#allocation27_spill]]  ;;  %s4366_s19 = scalar_lea.vmem %s4758_s18, 1024 }
  0x20   : > { %p4367_p0 = scmp.ne.s32.totalorder %s4758_s18, %s4366_s19  ;;  %p4374_p7 = scmp.lt.s32.totalorder %s4758_s18, %s4758_s18 }
  0x21   : > { %p4375_p8 = scmp.lt.s32.totalorder %s4366_s19, %s4366_s19 }
  0x22   : > { %p4369_p1 = pnand %p4367_p0, %p4764_p6 }
  0x23   : > { %p4376_p9 = por %p4375_p8, %p4374_p7 }
  0x24   : > { %p4370_p4 = pneg %p4369_p1 }
  0x25   : > { %4150 = dma.hbm_to_vmem [thread:$0]  (!%p4754_p5), %s5512_s1, 2048, %s379_s29, [#allocation9], %s4638_s23, %s4638_s23, %s4639_s24  }
  0x26   : > { %p4377_p10 = pnand %p4376_p9, %p4370_p4 }
  0x28   : > { %4380 = shalt.err (!%p4377_p10)
}
  0x29   : > { %s5502_s22 = smov 64   ;;  %s4641_s28 = smov 4  }
  0x2a   : > { %4156 = dma.hbm_to_vmem [thread:$0]  (!%p4754_p5), %s5490_s3, 1024, %s4758_s18, [#allocation12], %s5502_s22, %s5502_s22, %s4641_s28  }
  0x2b   : > { %s4392_s24 = scalar_lea.vmem %s4760_s20, 1024  ;;  %p4400_p0 = scmp.lt.s32.totalorder %s4760_s20, %s4760_s20 }
  0x2c   : > { %p4393_p11 = scmp.ne.s32.totalorder %s4760_s20, %s4392_s24  ;;  %p4401_p1 = scmp.lt.s32.totalorder %s4392_s24, %s4392_s24 }
  0x2e   : > { %p4395_p12 = pnand %p4393_p11, %p4764_p6  ;;  %p4402_p4 = por %p4401_p1, %p4400_p0 }
  0x30   : > { %p4396_p13 = pneg %p4395_p12 }
  0x32   : > { %p4403_p7 = pnand %p4402_p4, %p4396_p13 }
  0x34   : > { %4406 = shalt.err (!%p4403_p7)
}
  0x35   : > { %4162 = dma.hbm_to_vmem [thread:$0]  (!%p4754_p5), %s5492_s5, 1024, %s4760_s20, [#allocation15], %s5502_s22, %s5502_s22, %s4641_s28  }
  0x36   : > { %s4642_s18 = smov [#allocation17]  }
  0x37   : > { %s458_s29 = sshll.u32 %s4642_s18, 4  ;;  %s459_s29 = int_to_ptr.vmem [resolvable:$true] %s458_s29 }
  0x38   : > { %s4418_s23 = scalar_lea.vmem %s459_s29, 3072  ;;  %p4426_p11 = scmp.lt.s32.totalorder %s459_s29, %s459_s29 }
  0x39   : > { %p4419_p8 = scmp.ne.s32.totalorder %s459_s29, %s4418_s23  ;;  %p4427_p12 = scmp.lt.s32.totalorder %s4418_s23, %s4418_s23 }
  0x3b   : > { %p4421_p9 = pnand %p4419_p8, %p4764_p6  ;;  %p4428_p13 = por %p4427_p12, %p4426_p11 }
  0x3d   : > { %p4422_p10 = pneg %p4421_p9 }
  0x3f   : > { %p4429_p0 = pnand %p4428_p13, %p4422_p10 }
  0x41   : > { %4432 = shalt.err (!%p4429_p0)
}
  0x42   : > { %4168 = dma.hbm_to_vmem [thread:$0]  (!%p4754_p5), %s5496_s9, 3072, %s459_s29, [#allocation18], %s5502_s22, %s5502_s22, %s4641_s28  }
  0x43   : > { %s38_s17 = sadd.s32 1, %s4629_s26  ;;  %s4643_s19 = smov [#allocation5]  }
  0x44   : > { %p39_p1 = scmp.ge.s32.totalorder %s38_s17, 3  ;;  %s365_s18 = sshll.u32 %s4643_s19, 4  ;;  %s366_s18 = int_to_ptr.vmem [resolvable:$true] %s365_s18 }
  0x45   : > { %s4644_s23 = smov [#allocation10]   ;;  %s4444_s1 = scalar_lea.vmem %s366_s18, 2048 }
  0x46   : > { %s5521_s17 = smov (%p39_p1, %s38_s17), 0  ;;  %s392_s30 = sshll.u32 %s4644_s23, 4  ;;  %s393_s30 = int_to_ptr.vmem [resolvable:$true] %s392_s30 }
  0x47   : > { %p4445_p4 = scmp.ne.s32.totalorder %s366_s18, %s4444_s1  ;;  %p4452_p9 = scmp.lt.s32.totalorder %s366_s18, %s366_s18 }
  0x48   : > { %p4453_p10 = scmp.lt.s32.totalorder %s4444_s1, %s4444_s1 }
  0x49   : > { %p4447_p7 = pnand %p4445_p4, %p4764_p6 }
  0x4a   : > { %p4454_p11 = por %p4453_p10, %p4452_p9 }
  0x4b   : > { %p4448_p8 = pneg %p4447_p7 }
  0x4d   : > { %p4455_p12 = pnand %p4454_p11, %p4448_p8 }
  0x4f   : > { %4458 = shalt.err (!%p4455_p12)
}
  0x50   : > { %4147 = dma.hbm_to_vmem [thread:$0]  (!%p4754_p5), %s5487_s0, 2048, %s366_s18, [#allocation6], %s5502_s22, %s5502_s22, %s4641_s28  }
  0x51   : > { %s4470_s20 = scalar_lea.vmem %s393_s30, 32  ;;  %p4478_p4 = scmp.lt.s32.totalorder %s393_s30, %s393_s30 }
  0x52   : > { %p4471_p13 = scmp.ne.s32.totalorder %s393_s30, %s4470_s20  ;;  %p4479_p7 = scmp.lt.s32.totalorder %s4470_s20, %s4470_s20 }
  0x54   : > { %p4473_p0 = pnand %p4471_p13, %p4764_p6  ;;  %p4480_p8 = por %p4479_p7, %p4478_p4 }
  0x56   : > { %p4474_p1 = pneg %p4473_p0 }
  0x58   : > { %p4481_p9 = pnand %p4480_p8, %p4474_p1 }
  0x5a   : > { %4484 = shalt.err (!%p4481_p9)
}
  0x5b   : > { %4153 = dma.hbm_to_vmem [thread:$0]  (!%p4754_p5), %s5489_s2, 32, %s393_s30, [#allocation9]  }
  0x5c   : > { %s4645_s23 = smov [#allocation13]   ;;  %s4646_s29 = smov [#allocation16]  }
  0x5d   : > { %s416_s18 = sshll.u32 %s4645_s23, 4  ;;  %s442_s24 = sshll.u32 %s4646_s29, 4  ;;  %s417_s18 = int_to_ptr.vmem [resolvable:$true] %s416_s18  ;;  %s443_s24 = int_to_ptr.vmem [resolvable:$true] %s442_s24 }
  0x5e   : > { %s4496_s22 = scalar_lea.vmem %s417_s18, 16  ;;  %s4503_s20 = scalar_lea.vmem %s417_s18, 32 }
  0x5f   : > { %p4497_p10 = scmp.ne.s32.totalorder %s417_s18, %s4496_s22  ;;  %p4504_p13 = scmp.lt.s32.totalorder %s417_s18, %s417_s18 }
  0x60   : > { %p4505_p0 = scmp.lt.s32.totalorder %s4503_s20, %s4496_s22 }
  0x61   : > { %p4499_p11 = pnand %p4497_p10, %p4764_p6 }
  0x62   : > { %p4506_p1 = por %p4505_p0, %p4504_p13 }
  0x63   : > { %p4500_p12 = pneg %p4499_p11 }
  0x65   : > { %p4507_p4 = pnand %p4506_p1, %p4500_p12 }
  0x67   : > { %4510 = shalt.err (!%p4507_p4)
}
  0x68   : > { %4159 = dma.hbm_to_vmem [thread:$0]  (!%p4754_p5), %s5491_s4, 16, %s417_s18, [#allocation12]  }
  0x69   : > { %s4522_s19 = scalar_lea.vmem %s443_s24, 3072  ;;  %p4530_p10 = scmp.lt.s32.totalorder %s443_s24, %s443_s24 }
  0x6a   : > { %p4523_p7 = scmp.ne.s32.totalorder %s443_s24, %s4522_s19  ;;  %p4531_p11 = scmp.lt.s32.totalorder %s4522_s19, %s4522_s19 }
  0x6c   : > { %p4525_p8 = pnand %p4523_p7, %p4764_p6  ;;  %p4532_p2 = por %p4531_p11, %p4530_p10 }
  0x6e   : > { %p4526_p9 = pneg %p4525_p8 }
  0x70   : > { %p4533_p3 = pnand %p4532_p2, %p4526_p9 }
  0x72   : > { %4536 = shalt.err (!%p4533_p3)
}
  0x73   : > { %s5513_s22 = smov 64   ;;  %s4647_s18 = smov [#allocation19]  }
  0x74   : > { %4165 = dma.hbm_to_vmem [thread:$0]  (!%p4754_p5), %s5494_s7, 3072, %s443_s24, [#allocation15], %s5513_s22, %s5513_s22, %s4641_s28  }
  0x75   : > { %s474_s20 = sshll.u32 %s4647_s18, 4  ;;  %s475_s20 = int_to_ptr.vmem [resolvable:$true] %s474_s20 }
  0x76   : > { %s4548_s1 = scalar_lea.vmem %s475_s20, 3072  ;;  %p4556_p2 = scmp.lt.s32.totalorder %s475_s20, %s475_s20 }
  0x77   : > { %p4549_p12 = scmp.ne.s32.totalorder %s475_s20, %s4548_s1  ;;  %p4557_p3 = scmp.lt.s32.totalorder %s4548_s1, %s4548_s1 }
  0x79   : > { %p4551_p13 = pnand %p4549_p12, %p4764_p6  ;;  %p4558_p1 = por %p4557_p3, %p4556_p2 }
  0x7b   : > { %p4552_p0 = pneg %p4551_p13 }
  0x7d   : > { %p4559_p4 = pnand %p4558_p1, %p4552_p0 }
  0x7f   : > { %4562 = shalt.err (!%p4559_p4)
}
  0x80   : > { %4171 = dma.hbm_to_vmem [thread:$0]  (!%p4754_p5), %s5498_s11, 3072, %s475_s20, [#allocation18], %s5513_s22, %s5513_s22, %s4641_s28  }
  0x81   : > { %p5514_p7 = scmp.ne.s32.totalorder %s5509_s15, 0 }
  0x82   : > { %p5515_p6 = scmp.ne.s32.totalorder (!%p5514_p7), %s5508_s14, 0 }
  0x83   : > { %493 = sbr.rel (%p5514_p7) target bundleno = 1696 (0x6a0), region = 72 }
  0x88   : > { %4600 = dma.done.wait (%p5515_p6), [#allocation6], 2048  }
  0x89   : > { %4602 = vsyncadd (%p5515_p6), [#allocation6], 4294965248 }
  0x8a   : > { %4604 = dma.done.wait (%p5515_p6), [#allocation9], 2080  }
  0x8b   : > { %4606 = vsyncadd (%p5515_p6), [#allocation9], 4294965216 }
  0x8c   : > { %4608 = dma.done.wait (%p5515_p6), [#allocation12], 1040  }
  0x8d   : > { %4610 = vsyncadd (%p5515_p6), [#allocation12], 4294966256 }
  0x8e   : > { %4612 = dma.done.wait (%p5515_p6), [#allocation15], 4096  }
  0x8f   : > { %4614 = vsyncadd (%p5515_p6), [#allocation15], 4294963200 }
  0x90   : > { %4616 = dma.done.wait (%p5515_p6), [#allocation18], 6144  }
  0x91   : > { %4618 = vsyncadd (%p5515_p6), [#allocation18], 4294961152  ;;  %p3303_p5 = scmp.ne.s32.totalorder %s4625_s25, 0 }
  0x93   : > { %565 = sbr.rel (%p3303_p5) target bundleno = 922 (0x39a), region = 112 }
  0x98   : > { %v4233_v0 = vld [vmem:[#allocation8 + $0x74] ss:$8 sps:$4 sm:$0xff]   ;;  %v4235_v1 = vld [vmem:[#allocation8 + $0x70] ss:$8 sps:$4 sm:$0xff]   ;;  %v4648_v2 = vmov 0   ;;  %v4257_v19 = vld [vmem:[#allocation5] sm:$0xff]   ;;  %v616_v41 = vlaneseq }
  0x99   : > { %834 = vmatprep.mubr.bf16.mxu0 %v4648_v2  ;;  %802 = vmatprep.subr.bf16.mxu0 %v4233_v0  ;;  %v4236_v3 = vld [vmem:[#allocation8 + $0x64] ss:$8 sps:$4 sm:$0xff]   ;;  %v4238_v4 = vld [vmem:[#allocation8 + $0x60] ss:$8 sps:$4 sm:$0xff]   ;;  %v4239_v5 = vld [vmem:[#allocation8 + $0x54] ss:$8 sps:$4 sm:$0xff]  }
  0x9a   : > { %803 = vmatpush1.bf16.msra.mxu0 %v4235_v1  ;;  %v4241_v6 = vld [vmem:[#allocation8 + $0x50] ss:$8 sps:$4 sm:$0xff]   ;;  %v4242_v7 = vld [vmem:[#allocation8 + $0x44] ss:$8 sps:$4 sm:$0xff]   ;;  %v4244_v8 = vld [vmem:[#allocation8 + $0x40] ss:$8 sps:$4 sm:$0xff]  }
  0x9b   : > { %804 = vmatprep.subr.bf16.mxu0 %v4236_v3  ;;  %v4245_v9 = vld [vmem:[#allocation8 + $0x34] ss:$8 sps:$4 sm:$0xff]   ;;  %v4247_v10 = vld [vmem:[#allocation8 + $0x30] ss:$8 sps:$4 sm:$0xff]   ;;  %v4248_v11 = vld [vmem:[#allocation8 + $0x24] ss:$8 sps:$4 sm:$0xff]  }
  0x9c   : > { %v4250_v12 = vld [vmem:[#allocation8 + $0x20] ss:$8 sps:$4 sm:$0xff]   ;;  %v4251_v13 = vld [vmem:[#allocation8 + $0x14] ss:$8 sps:$4 sm:$0xff]   ;;  %v4253_v14 = vld [vmem:[#allocation8 + $0x10] ss:$8 sps:$4 sm:$0xff]  }
  0x9d   : > { %v4254_v15 = vld [vmem:[#allocation8 + $0x4] ss:$8 sps:$4 sm:$0xff]   ;;  %v4256_v16 = vld [vmem:[#allocation8] ss:$8 sps:$4 sm:$0xff]   ;;  %v4274_v18 = vld [vmem:[#allocation11 + $0x30] sm:$0xff]   ;;  %v4901_v42 = vshrl.u32 %v616_v41, 7 }
  0x9e   : > { %805 = vmatpush1.bf16.msra.mxu0 %v4238_v4  ;;  %v4273_v17 = vld [vmem:[#allocation11 + $0x38] sm:$0xff]   ;;  %v4275_v20 = vld [vmem:[#allocation11 + $0x28] sm:$0xff]   ;;  %v4276_v21 = vld [vmem:[#allocation11 + $0x20] sm:$0xff]  }
  0x9f   : > { %806 = vmatprep.subr.bf16.mxu0 %v4239_v5  ;;  %3848 = vmatprep.subr.bf16.mxu1 %v4273_v17  ;;  %v4258_v22 = vld [vmem:[#allocation5 + $0x8] sm:$0xff]   ;;  %v4259_v23 = vld [vmem:[#allocation5 + $0x10] sm:$0xff]   ;;  %v4260_v24 = vld [vmem:[#allocation5 + $0x18] sm:$0xff]   ;;  %v618_v43 = vsub.s32 0, %v4901_v42 }
  0xa0   : > { %3849 = vmatpush3.bf16.msra.mxu1 %v4273_v17  ;;  %v4261_v25 = vld [vmem:[#allocation5 + $0x20] sm:$0xff]   ;;  %v4262_v26 = vld [vmem:[#allocation5 + $0x28] sm:$0xff]   ;;  %v4263_v27 = vld [vmem:[#allocation5 + $0x30] sm:$0xff]  }
  0xa1   : > { %3850 = vmatprep.subr.bf16.mxu1 %v4274_v18  ;;  %v4264_v28 = vld [vmem:[#allocation5 + $0x38] sm:$0xff]   ;;  %v4265_v29 = vld [vmem:[#allocation5 + $0x40] sm:$0xff]   ;;  %v4266_v31 = vld [vmem:[#allocation5 + $0x48] sm:$0xff]  }
  0xa2   : > { %807 = vmatpush1.bf16.msra.mxu0 %v4241_v6  ;;  %v4277_v30 = vld [vmem:[#allocation11 + $0x18] sm:$0xff]   ;;  %v4278_v32 = vld [vmem:[#allocation11 + $0x10] sm:$0xff]   ;;  %v4279_v33 = vld [vmem:[#allocation11 + $0x8] sm:$0xff]  }
  0xa3   : > { %808 = vmatprep.subr.bf16.mxu0 %v4242_v7  ;;  %v4267_v34 = vld [vmem:[#allocation5 + $0x50] sm:$0xff]   ;;  %v4280_v35 = vld [vmem:[#allocation11] sm:$0xff]   ;;  %v4268_v36 = vld [vmem:[#allocation5 + $0x58] sm:$0xff]  }
  0xa4   : > { %3851 = vmatpush3.bf16.msra.mxu1 %v4274_v18  ;;  %v4269_v37 = vld [vmem:[#allocation5 + $0x60] sm:$0xff]   ;;  %v4270_v38 = vld [vmem:[#allocation5 + $0x68] sm:$0xff]   ;;  %v4271_v39 = vld [vmem:[#allocation5 + $0x70] sm:$0xff]  }
  0xa5   : > { %3852 = vmatprep.subr.bf16.mxu1 %v4275_v20  ;;  %v4272_v40 = vld [vmem:[#allocation5 + $0x78] sm:$0xff]   ;;  %v4904_v44 = vld [vmem:[#allocation10] sm:$0x3]  ;;  %v4283_v7 = vld [vmem:[#allocation14 + $0x28] sm:$0xff]  }
  0xa6   : > { %809 = vmatpush1.bf16.msra.mxu0 %v4244_v8  ;;  %v4907_v45 = vrot.slane %v4904_v44, %v618_v43  ;;  %v4281_v49 = vld [vmem:[#allocation14 + $0x38] sm:$0xff]  }
  0xa7   : > { %810 = vmatprep.subr.bf16.mxu0 %v4245_v9  ;;  %v4285_v18 = vld [vmem:[#allocation14 + $0x18] sm:$0xff]  }
  0xa8   : > { %3853 = vmatpush3.bf16.msra.mxu1 %v4275_v20 }
  0xa9   : > { %3854 = vmatprep.subr.bf16.mxu1 %v4276_v21 }
  0xaa   : > { %811 = vmatpush1.bf16.msra.mxu0 %v4247_v10 }
  0xab   : > { %812 = vmatprep.subr.bf16.mxu0 %v4248_v11 }
  0xac   : > { %3855 = vmatpush3.bf16.msra.mxu1 %v4276_v21 }
  0xad   : > { %3856 = vmatprep.subr.bf16.mxu1 %v4277_v30 }
  0xae   : > { %813 = vmatpush1.bf16.msra.mxu0 %v4250_v12 }
  0xaf   : > { %814 = vmatprep.subr.bf16.mxu0 %v4251_v13  ;;  %v4284_v13 = vld [vmem:[#allocation14 + $0x20] sm:$0xff]  }
  0xb0   : > { %3857 = vmatpush3.bf16.msra.mxu1 %v4277_v30 }
  0xb1   : > { %3858 = vmatprep.subr.bf16.mxu1 %v4278_v32 }
  0xb2   : > { %815 = vmatpush1.bf16.msra.mxu0 %v4253_v14 }
  0xb3   : > { %816 = vmatprep.subr.bf16.mxu0 %v4254_v15 }
  0xb4   : > { %3859 = vmatpush3.bf16.msra.mxu1 %v4278_v32 }
  0xb5   : > { %3860 = vmatprep.subr.bf16.mxu1 %v4279_v33 }
  0xb6   : > { %817 = vmatpush1.bf16.msra.mxu0 %v4256_v16 }
  0xb8   : > { %3861 = vmatpush3.bf16.msra.mxu1 %v4279_v33 }
  0xb9   : > { %835 = vmatmul.mubr.bf16.vlgmr.msra.gmra.mxu0 %v4257_v19  ;;  %3862 = vmatprep.subr.bf16.mxu1 %v4280_v35 }
  0xba   : > { %844 = vmatprep.mubr.bf16.mxu0 %v4648_v2 }
  0xbc   : > { %3863 = vmatpush3.bf16.msra.mxu1 %v4280_v35 }
  0xbd   : > { %3896 = vmatprep.subr.bf16.mxu1 %v4281_v49 }
  0xc1   : > { %845 = vmatmul.mubr.bf16.gmra.mxu0 %v4258_v22 }
  0xc2   : > { %854 = vmatprep.mubr.bf16.mxu0 %v4648_v2 }
  0xc9   : > { %855 = vmatmul.mubr.bf16.gmra.mxu0 %v4259_v23 }
  0xca   : > { %864 = vmatprep.mubr.bf16.mxu0 %v4648_v2 }
  0xd1   : > { %865 = vmatmul.mubr.bf16.gmra.mxu0 %v4260_v24 }
  0xd2   : > { %874 = vmatprep.mubr.bf16.mxu0 %v4648_v2 }
  0xd9   : > { %875 = vmatmul.mubr.bf16.gmra.mxu0 %v4261_v25 }
  0xda   : > { %884 = vmatprep.mubr.bf16.mxu0 %v4648_v2 }
  0xe1   : > { %885 = vmatmul.mubr.bf16.gmra.mxu0 %v4262_v26 }
  0xe2   : > { %894 = vmatprep.mubr.bf16.mxu0 %v4648_v2 }
  0xe9   : > { %895 = vmatmul.mubr.bf16.gmra.mxu0 %v4263_v27 }
  0xea   : > { %904 = vmatprep.mubr.bf16.mxu0 %v4648_v2 }
  0xf1   : > { %905 = vmatmul.mubr.bf16.gmra.mxu0 %v4264_v28 }
  0xf2   : > { %914 = vmatprep.mubr.bf16.mxu0 %v4648_v2 }
  0xf9   : > { %915 = vmatmul.mubr.bf16.gmra.mxu0 %v4265_v29 }
  0xfa   : > { %924 = vmatprep.mubr.bf16.mxu0 %v4648_v2 }
 0x101   : > { %925 = vmatmul.mubr.bf16.gmra.mxu0 %v4266_v31 }
 0x102   : > { %934 = vmatprep.mubr.bf16.mxu0 %v4648_v2 }
 0x109   : > { %935 = vmatmul.mubr.bf16.gmra.mxu0 %v4267_v34 }
 0x10a   : > { %944 = vmatprep.mubr.bf16.mxu0 %v4648_v2 }
 0x111   : > { %945 = vmatmul.mubr.bf16.gmra.mxu0 %v4268_v36 }
 0x112   : > { %954 = vmatprep.mubr.bf16.mxu0 %v4648_v2 }
 0x119   : > { %955 = vmatmul.mubr.bf16.gmra.mxu0 %v4269_v37 }
 0x11a   : > { %964 = vmatprep.mubr.bf16.mxu0 %v4648_v2 }
 0x121   : > { %965 = vmatmul.mubr.bf16.gmra.mxu0 %v4270_v38 }
 0x122   : > { %974 = vmatprep.mubr.bf16.mxu0 %v4648_v2 }
 0x129   : > { %975 = vmatmul.mubr.bf16.gmra.mxu0 %v4271_v39 }
 0x12a   : > { %984 = vmatprep.mubr.bf16.mxu0 %v4648_v2  ;;  %v4282_v2 = vld [vmem:[#allocation14 + $0x30] sm:$0xff]  }
 0x131   : > { %985 = vmatmul.mubr.bf16.gmra.mxu0 %v4272_v40 }
 0x179   : > { %v836_v46 = vpop.f32.mrf.mxu0 }
 0x17a   : > { %v837_v48 = vadd.f32 %v836_v46, %v4907_v45 }
 0x17b   : > { %v4909_v47 = vpop.f32.mrf.mxu0 }
 0x17c   : > { %v995_v53 = vmax.f32 %v837_v48, 0.0 }
 0x17d   : > { %v840_v50 = vpop.f32.mrf.mxu0 }
 0x17e   : > { %v841_v51 = vadd.f32 %v840_v50, %v4907_v45 }
 0x17f   : > { %v4913_v52 = vpop.f32.mrf.mxu0 }
 0x180   : > { %v997_v54 = vmax.f32 %v841_v51, 0.0 }
 0x181   : > { %v846_v55 = vpop.f32.mrf.mxu0 }
 0x182   : > { %v1059_v56 = vpack.c.bf16 %v997_v54, %v995_v53  ;;  %v847_v58 = vadd.f32 %v846_v55, %v4907_v45 }
 0x183   : > { %v4915_v57 = vpop.f32.mrf.mxu0 }
 0x184   : > { %3864 = vmatprep.mubr.bf16.mxu1 %v1059_v56  ;;  %v999_v62 = vmax.f32 %v847_v58, 0.0 }
 0x185   : > { %v850_v59 = vpop.f32.mrf.mxu0 }
 0x186   : > { %v851_v60 = vadd.f32 %v850_v59, %v4907_v45 }
 0x187   : > { %v4919_v61 = vpop.f32.mrf.mxu0 }
 0x188   : > { %v1001_v63 = vmax.f32 %v851_v60, 0.0 }
 0x189   : > { %v856_v0 = vpop.f32.mrf.mxu0 }
 0x18a   : > { %v1060_v1 = vpack.c.bf16 %v1001_v63, %v999_v62  ;;  %v857_v4 = vadd.f32 %v856_v0, %v4907_v45 }
 0x18b   : > { %v4921_v3 = vpop.f32.mrf.mxu0 }
 0x18c   : > { %3865 = vmatmul.mubr.bf16.vlgmr.msra.gmra.mxu1 %v1060_v1  ;;  %v1003_v9 = vmax.f32 %v857_v4, 0.0 }
 0x18d   : > { %v860_v5 = vpop.f32.mrf.mxu0  ;;  %3897 = vmatpush3.bf16.msra.mxu1 %v4281_v49 }
 0x18e   : > { %v861_v6 = vadd.f32 %v860_v5, %v4907_v45  ;;  %3898 = vmatprep.subr.bf16.mxu1 %v4282_v2 }
 0x18f   : > { %v4925_v8 = vpop.f32.mrf.mxu0 }
 0x190   : > { %v1005_v10 = vmax.f32 %v861_v6, 0.0 }
 0x191   : > { %v866_v11 = vpop.f32.mrf.mxu0  ;;  %3899 = vmatpush3.bf16.msra.mxu1 %v4282_v2 }
 0x192   : > { %v1061_v12 = vpack.c.bf16 %v1005_v10, %v1003_v9  ;;  %3900 = vmatprep.subr.bf16.mxu1 %v4283_v7  ;;  %v867_v15 = vadd.f32 %v866_v11, %v4907_v45 }
 0x193   : > { %v4927_v14 = vpop.f32.mrf.mxu0 }
 0x194   : > { %3868 = vmatprep.mubr.bf16.mxu1 %v1061_v12  ;;  %v1007_v20 = vmax.f32 %v867_v15, 0.0 }
 0x195   : > { %v870_v16 = vpop.f32.mrf.mxu0  ;;  %3901 = vmatpush3.bf16.msra.mxu1 %v4283_v7 }
 0x196   : > { %v871_v17 = vadd.f32 %v870_v16, %v4907_v45  ;;  %3902 = vmatprep.subr.bf16.mxu1 %v4284_v13 }
 0x197   : > { %v4931_v19 = vpop.f32.mrf.mxu0 }
 0x198   : > { %v1009_v21 = vmax.f32 %v871_v17, 0.0 }
 0x199   : > { %v876_v22 = vpop.f32.mrf.mxu0  ;;  %3903 = vmatpush3.bf16.msra.mxu1 %v4284_v13 }
 0x19a   : > { %v1062_v23 = vpack.c.bf16 %v1009_v21, %v1007_v20  ;;  %3904 = vmatprep.subr.bf16.mxu1 %v4285_v18  ;;  %v877_v25 = vadd.f32 %v876_v22, %v4907_v45 }
 0x19b   : > { %v4933_v24 = vpop.f32.mrf.mxu0 }
 0x19c   : > { %3869 = vmatmul.mubr.bf16.gmra.mxu1 %v1062_v23  ;;  %v1011_v29 = vmax.f32 %v877_v25, 0.0 }
 0x19d   : > { %v880_v26 = vpop.f32.mrf.mxu0  ;;  %3905 = vmatpush3.bf16.msra.mxu1 %v4285_v18 }
 0x19e   : > { %v881_v27 = vadd.f32 %v880_v26, %v4907_v45 }
 0x19f   : > { %v4937_v28 = vpop.f32.mrf.mxu0 }
 0x1a0   : > { %v1013_v30 = vmax.f32 %v881_v27, 0.0 }
 0x1a1   : > { %v886_v31 = vpop.f32.mrf.mxu0 }
 0x1a2   : > { %v1063_v32 = vpack.c.bf16 %v1013_v30, %v1011_v29  ;;  %v887_v34 = vadd.f32 %v886_v31, %v4907_v45  ;;  %v4286_v29 = vld [vmem:[#allocation14 + $0x10] sm:$0xff]  }
 0x1a3   : > { %v4939_v33 = vpop.f32.mrf.mxu0  ;;  %3906 = vmatprep.subr.bf16.mxu1 %v4286_v29 }
 0x1a4   : > { %3872 = vmatprep.mubr.bf16.mxu1 %v1063_v32  ;;  %v1015_v38 = vmax.f32 %v887_v34, 0.0  ;;  %3907 = vmatpush3.bf16.msra.mxu1 %v4286_v29 }
 0x1a5   : > { %v890_v35 = vpop.f32.mrf.mxu0 }
 0x1a6   : > { %v891_v36 = vadd.f32 %v890_v35, %v4907_v45 }
 0x1a7   : > { %v4943_v37 = vpop.f32.mrf.mxu0 }
 0x1a8   : > { %v1017_v39 = vmax.f32 %v891_v36, 0.0  ;;  %v4287_v36 = vld [vmem:[#allocation14 + $0x8] sm:$0xff]  }
 0x1a9   : > { %v896_v40 = vpop.f32.mrf.mxu0  ;;  %3908 = vmatprep.subr.bf16.mxu1 %v4287_v36 }
 0x1aa   : > { %v1064_v41 = vpack.c.bf16 %v1017_v39, %v1015_v38  ;;  %v897_v46 = vadd.f32 %v896_v40, %v4907_v45  ;;  %3909 = vmatpush3.bf16.msra.mxu1 %v4287_v36 }
 0x1ab   : > { %v4945_v43 = vpop.f32.mrf.mxu0 }
 0x1ac   : > { %3873 = vmatmul.mubr.bf16.gmra.mxu1 %v1064_v41  ;;  %v1019_v51 = vmax.f32 %v897_v46, 0.0  ;;  %v4288_v46 = vld [vmem:[#allocation14] sm:$0xff]  }
 0x1ad   : > { %v900_v48 = vpop.f32.mrf.mxu0  ;;  %3910 = vmatprep.subr.bf16.mxu1 %v4288_v46 }
 0x1ae   : > { %v901_v49 = vadd.f32 %v900_v48, %v4907_v45  ;;  %3911 = vmatpush3.bf16.msra.mxu1 %v4288_v46 }
 0x1af   : > { %v4949_v50 = vpop.f32.mrf.mxu0 }
 0x1b0   : > { %v1021_v53 = vmax.f32 %v901_v49, 0.0 }
 0x1b1   : > { %v906_v54 = vpop.f32.mrf.mxu0 }
 0x1b2   : > { %v1065_v55 = vpack.c.bf16 %v1021_v53, %v1019_v51  ;;  %v907_v58 = vadd.f32 %v906_v54, %v4907_v45 }
 0x1b3   : > { %v4951_v56 = vpop.f32.mrf.mxu0 }
 0x1b4   : > { %3876 = vmatprep.mubr.bf16.mxu1 %v1065_v55  ;;  %v1023_v63 = vmax.f32 %v907_v58, 0.0 }
 0x1b5   : > { %v910_v59 = vpop.f32.mrf.mxu0 }
 0x1b6   : > { %v911_v60 = vadd.f32 %v910_v59, %v4907_v45 }
 0x1b7   : > { %v4955_v62 = vpop.f32.mrf.mxu0 }
 0x1b8   : > { %v1025_v0 = vmax.f32 %v911_v60, 0.0 }
 0x1b9   : > { %v916_v1 = vpop.f32.mrf.mxu0 }
 0x1ba   : > { %v1066_v2 = vpack.c.bf16 %v1025_v0, %v1023_v63  ;;  %v917_v5 = vadd.f32 %v916_v1, %v4907_v45 }
 0x1bb   : > { %v4957_v4 = vpop.f32.mrf.mxu0 }
 0x1bc   : > { %3877 = vmatmul.mubr.bf16.gmra.mxu1 %v1066_v2  ;;  %v1027_v10 = vmax.f32 %v917_v5, 0.0 }
 0x1bd   : > { %v920_v6 = vpop.f32.mrf.mxu0 }
 0x1be   : > { %v921_v7 = vadd.f32 %v920_v6, %v4907_v45 }
 0x1bf   : > { %v4961_v9 = vpop.f32.mrf.mxu0 }
 0x1c0   : > { %v1029_v11 = vmax.f32 %v921_v7, 0.0 }
 0x1c1   : > { %v926_v12 = vpop.f32.mrf.mxu0 }
 0x1c2   : > { %v1067_v13 = vpack.c.bf16 %v1029_v11, %v1027_v10  ;;  %v927_v16 = vadd.f32 %v926_v12, %v4907_v45 }
 0x1c3   : > { %v4963_v15 = vpop.f32.mrf.mxu0 }
 0x1c4   : > { %3880 = vmatprep.mubr.bf16.mxu1 %v1067_v13  ;;  %v1031_v21 = vmax.f32 %v927_v16, 0.0 }
 0x1c5   : > { %v930_v17 = vpop.f32.mrf.mxu0 }
 0x1c6   : > { %v931_v18 = vadd.f32 %v930_v17, %v4907_v45 }
 0x1c7   : > { %v4967_v20 = vpop.f32.mrf.mxu0 }
 0x1c8   : > { %v1033_v22 = vmax.f32 %v931_v18, 0.0 }
 0x1c9   : > { %v936_v23 = vpop.f32.mrf.mxu0 }
 0x1ca   : > { %v1068_v25 = vpack.c.bf16 %v1033_v22, %v1031_v21  ;;  %v937_v27 = vadd.f32 %v936_v23, %v4907_v45 }
 0x1cb   : > { %v4969_v26 = vpop.f32.mrf.mxu0 }
 0x1cc   : > { %3881 = vmatmul.mubr.bf16.gmra.mxu1 %v1068_v25  ;;  %v1035_v34 = vmax.f32 %v937_v27, 0.0 }
 0x1cd   : > { %v940_v30 = vpop.f32.mrf.mxu0 }
 0x1ce   : > { %v941_v31 = vadd.f32 %v940_v30, %v4907_v45 }
 0x1cf   : > { %v4973_v32 = vpop.f32.mrf.mxu0 }
 0x1d0   : > { %v1037_v35 = vmax.f32 %v941_v31, 0.0 }
 0x1d1   : > { %v946_v38 = vpop.f32.mrf.mxu0 }
 0x1d2   : > { %v1069_v39 = vpack.c.bf16 %v1037_v35, %v1035_v34  ;;  %v947_v41 = vadd.f32 %v946_v38, %v4907_v45 }
 0x1d3   : > { %v4975_v40 = vpop.f32.mrf.mxu0 }
 0x1d4   : > { %3884 = vmatprep.mubr.bf16.mxu1 %v1069_v39  ;;  %v1039_v53 = vmax.f32 %v947_v41, 0.0 }
 0x1d5   : > { %v950_v48 = vpop.f32.mrf.mxu0 }
 0x1d6   : > { %v951_v49 = vadd.f32 %v950_v48, %v4907_v45 }
 0x1d7   : > { %v4979_v51 = vpop.f32.mrf.mxu0 }
 0x1d8   : > { %v1041_v54 = vmax.f32 %v951_v49, 0.0 }
 0x1d9   : > { %v956_v55 = vpop.f32.mrf.mxu0 }
 0x1da   : > { %v1070_v58 = vpack.c.bf16 %v1041_v54, %v1039_v53  ;;  %v957_v60 = vadd.f32 %v956_v55, %v4907_v45 }
 0x1db   : > { %v4981_v59 = vpop.f32.mrf.mxu0 }
 0x1dc   : > { %3885 = vmatmul.mubr.bf16.gmra.mxu1 %v1070_v58  ;;  %v1043_v2 = vmax.f32 %v957_v60, 0.0  ;;  %v5003_v58 = vld [vmem:[#allocation13] ss:$0 sm:$0xff] }
 0x1dd   : > { %v960_v63 = vpop.f32.mrf.mxu0 }
 0x1de   : > { %v961_v0 = vadd.f32 %v960_v63, %v4907_v45 }
 0x1df   : > { %v4985_v1 = vpop.f32.mrf.mxu0 }
 0x1e0   : > { %v1045_v5 = vmax.f32 %v961_v0, 0.0 }
 0x1e1   : > { %v966_v6 = vpop.f32.mrf.mxu0 }
 0x1e2   : > { %v1071_v7 = vpack.c.bf16 %v1045_v5, %v1043_v2  ;;  %v967_v11 = vadd.f32 %v966_v6, %v4907_v45 }
 0x1e3   : > { %v4987_v10 = vpop.f32.mrf.mxu0 }
 0x1e4   : > { %3888 = vmatprep.mubr.bf16.mxu1 %v1071_v7  ;;  %v1047_v17 = vmax.f32 %v967_v11, 0.0 }
 0x1e5   : > { %v970_v12 = vpop.f32.mrf.mxu0 }
 0x1e6   : > { %v971_v13 = vadd.f32 %v970_v12, %v4907_v45 }
 0x1e7   : > { %v4991_v16 = vpop.f32.mrf.mxu0 }
 0x1e8   : > { %v1049_v18 = vmax.f32 %v971_v13, 0.0 }
 0x1e9   : > { %v976_v21 = vpop.f32.mrf.mxu0 }
 0x1ea   : > { %v1072_v22 = vpack.c.bf16 %v1049_v18, %v1047_v17  ;;  %v977_v25 = vadd.f32 %v976_v21, %v4907_v45 }
 0x1eb   : > { %v4993_v23 = vpop.f32.mrf.mxu0 }
 0x1ec   : > { %3889 = vmatmul.mubr.bf16.gmra.mxu1 %v1072_v22  ;;  %v1051_v31 = vmax.f32 %v977_v25, 0.0 }
 0x1ed   : > { %v980_v27 = vpop.f32.mrf.mxu0 }
 0x1ee   : > { %v981_v29 = vadd.f32 %v980_v27, %v4907_v45 }
 0x1ef   : > { %v4997_v30 = vpop.f32.mrf.mxu0 }
 0x1f0   : > { %v1053_v34 = vmax.f32 %v981_v29, 0.0 }
 0x1f1   : > { %v986_v35 = vpop.f32.mrf.mxu0 }
 0x1f2   : > { %v1073_v36 = vpack.c.bf16 %v1053_v34, %v1051_v31  ;;  %v987_v39 = vadd.f32 %v986_v35, %v4907_v45 }
 0x1f3   : > { %v4999_v38 = vpop.f32.mrf.mxu0 }
 0x1f4   : > { %3892 = vmatprep.mubr.bf16.mxu1 %v1073_v36  ;;  %v1055_v48 = vmax.f32 %v987_v39, 0.0 }
 0x1f5   : > { %v990_v41 = vpop.f32.mrf.mxu0 }
 0x1f6   : > { %v991_v46 = vadd.f32 %v990_v41, %v4907_v45 }
 0x1f8   : > { %v1057_v49 = vmax.f32 %v991_v46, 0.0 }
 0x1fa   : > { %v1074_v53 = vpack.c.bf16 %v1057_v49, %v1055_v48 }
 0x1fc   : > { %3893 = vmatmul.mubr.bf16.gmra.mxu1 %v1074_v53 }
 0x24c   : > { %v3866_v54 = vpop.f32.mrf.mxu1 }
 0x24d   : > { %v1189_v2 = vadd.f32 %v3866_v54, %v5003_v58 }
 0x24e   : > { %v1180_v55 = vpop.f32.mrf.mxu1 }
 0x24f   : > { %v1181_v63 = vadd.f32 %v5003_v58, %v1180_v55  ;;  %v1309_v12 = vmax.f32 %v1189_v2, 0.0 }
 0x250   : > { %v3867_v60 = vpop.f32.mrf.mxu1 }
 0x251   : > { %v1192_v0 = vadd.f32 %v3867_v60, %v5003_v58  ;;  %v1307_v45 = vmax.f32 %v1181_v63, 0.0 }
 0x252   : > { %v1183_v5 = vpop.f32.mrf.mxu1 }
 0x253   : > { %v1184_v6 = vadd.f32 %v5003_v58, %v1183_v5  ;;  %v1310_v7 = vmax.f32 %v1192_v0, 0.0 }
 0x255   : > { %v1308_v11 = vmax.f32 %v1184_v6, 0.0  ;;  %v1340_v17 = vpack.c.bf16 %v1310_v7, %v1309_v12 }
 0x257   : > { %v1339_v13 = vpack.c.bf16 %v1308_v11, %v1307_v45 }
 0x259   : > { %3912 = vmatprep.mubr.bf16.mxu1 %v1339_v13 }
 0x25a   : > { %3913 = vmatmul.mubr.bf16.vlgmr.msra.gmra.mxu1 %v1340_v17 }
 0x25c   : > { %v3870_v18 = vpop.f32.mrf.mxu1 }
 0x25d   : > { %v1205_v29 = vadd.f32 %v3870_v18, %v5003_v58 }
 0x25e   : > { %v1196_v21 = vpop.f32.mrf.mxu1 }
 0x25f   : > { %v1197_v25 = vadd.f32 %v5003_v58, %v1196_v21  ;;  %v1313_v41 = vmax.f32 %v1205_v29, 0.0 }
 0x260   : > { %v3871_v22 = vpop.f32.mrf.mxu1 }
 0x261   : > { %v1208_v27 = vadd.f32 %v3871_v22, %v5003_v58  ;;  %v1311_v36 = vmax.f32 %v1197_v25, 0.0 }
 0x262   : > { %v1199_v31 = vpop.f32.mrf.mxu1 }
 0x263   : > { %v1200_v34 = vadd.f32 %v5003_v58, %v1199_v31  ;;  %v1314_v35 = vmax.f32 %v1208_v27, 0.0 }
 0x265   : > { %v1312_v39 = vmax.f32 %v1200_v34, 0.0  ;;  %v1342_v48 = vpack.c.bf16 %v1314_v35, %v1313_v41 }
 0x267   : > { %v1341_v46 = vpack.c.bf16 %v1312_v39, %v1311_v36 }
 0x269   : > { %3916 = vmatprep.mubr.bf16.mxu1 %v1341_v46 }
 0x26a   : > { %3917 = vmatmul.mubr.bf16.gmra.mxu1 %v1342_v48 }
 0x26c   : > { %v3874_v49 = vpop.f32.mrf.mxu1 }
 0x26d   : > { %v1221_v63 = vadd.f32 %v3874_v49, %v5003_v58 }
 0x26e   : > { %v1212_v53 = vpop.f32.mrf.mxu1 }
 0x26f   : > { %v1213_v55 = vadd.f32 %v5003_v58, %v1212_v53  ;;  %v1317_v45 = vmax.f32 %v1221_v63, 0.0 }
 0x270   : > { %v3875_v54 = vpop.f32.mrf.mxu1 }
 0x271   : > { %v1224_v60 = vadd.f32 %v3875_v54, %v5003_v58  ;;  %v1315_v6 = vmax.f32 %v1213_v55, 0.0 }
 0x272   : > { %v1215_v0 = vpop.f32.mrf.mxu1 }
 0x273   : > { %v1216_v2 = vadd.f32 %v5003_v58, %v1215_v0  ;;  %v1318_v5 = vmax.f32 %v1224_v60, 0.0 }
 0x275   : > { %v1316_v7 = vmax.f32 %v1216_v2, 0.0  ;;  %v1344_v12 = vpack.c.bf16 %v1318_v5, %v1317_v45 }
 0x277   : > { %v1343_v11 = vpack.c.bf16 %v1316_v7, %v1315_v6 }
 0x279   : > { %3920 = vmatprep.mubr.bf16.mxu1 %v1343_v11 }
 0x27a   : > { %3921 = vmatmul.mubr.bf16.gmra.mxu1 %v1344_v12 }
 0x27c   : > { %v3878_v13 = vpop.f32.mrf.mxu1 }
 0x27d   : > { %v1237_v25 = vadd.f32 %v3878_v13, %v5003_v58 }
 0x27e   : > { %v1228_v17 = vpop.f32.mrf.mxu1 }
 0x27f   : > { %v1229_v21 = vadd.f32 %v5003_v58, %v1228_v17  ;;  %v1321_v36 = vmax.f32 %v1237_v25, 0.0 }
 0x280   : > { %v3879_v18 = vpop.f32.mrf.mxu1 }
 0x281   : > { %v1240_v22 = vadd.f32 %v3879_v18, %v5003_v58  ;;  %v1319_v34 = vmax.f32 %v1229_v21, 0.0 }
 0x282   : > { %v1231_v27 = vpop.f32.mrf.mxu1 }
 0x283   : > { %v1232_v29 = vadd.f32 %v5003_v58, %v1231_v27  ;;  %v1322_v31 = vmax.f32 %v1240_v22, 0.0 }
 0x285   : > { %v1320_v35 = vmax.f32 %v1232_v29, 0.0  ;;  %v1346_v41 = vpack.c.bf16 %v1322_v31, %v1321_v36 }
 0x287   : > { %v1345_v39 = vpack.c.bf16 %v1320_v35, %v1319_v34 }
 0x289   : > { %3924 = vmatprep.mubr.bf16.mxu1 %v1345_v39 }
 0x28a   : > { %3925 = vmatmul.mubr.bf16.gmra.mxu1 %v1346_v41 }
 0x28c   : > { %v3882_v46 = vpop.f32.mrf.mxu1 }
 0x28d   : > { %v1253_v55 = vadd.f32 %v3882_v46, %v5003_v58 }
 0x28e   : > { %v1244_v48 = vpop.f32.mrf.mxu1 }
 0x28f   : > { %v1245_v53 = vadd.f32 %v5003_v58, %v1244_v48  ;;  %v1325_v6 = vmax.f32 %v1253_v55, 0.0 }
 0x290   : > { %v3883_v49 = vpop.f32.mrf.mxu1 }
 0x291   : > { %v1256_v54 = vadd.f32 %v3883_v49, %v5003_v58  ;;  %v1323_v2 = vmax.f32 %v1245_v53, 0.0 }
 0x292   : > { %v1247_v60 = vpop.f32.mrf.mxu1 }
 0x293   : > { %v1248_v63 = vadd.f32 %v5003_v58, %v1247_v60  ;;  %v1326_v0 = vmax.f32 %v1256_v54, 0.0 }
 0x295   : > { %v1324_v5 = vmax.f32 %v1248_v63, 0.0  ;;  %v1348_v45 = vpack.c.bf16 %v1326_v0, %v1325_v6 }
 0x297   : > { %v1347_v7 = vpack.c.bf16 %v1324_v5, %v1323_v2 }
 0x299   : > { %3928 = vmatprep.mubr.bf16.mxu1 %v1347_v7 }
 0x29a   : > { %3929 = vmatmul.mubr.bf16.gmra.mxu1 %v1348_v45 }
 0x29c   : > { %v3886_v11 = vpop.f32.mrf.mxu1 }
 0x29d   : > { %v1269_v21 = vadd.f32 %v3886_v11, %v5003_v58 }
 0x29e   : > { %v1260_v12 = vpop.f32.mrf.mxu1 }
 0x29f   : > { %v1261_v17 = vadd.f32 %v5003_v58, %v1260_v12  ;;  %v1329_v34 = vmax.f32 %v1269_v21, 0.0 }
 0x2a0   : > { %v3887_v13 = vpop.f32.mrf.mxu1 }
 0x2a1   : > { %v1272_v18 = vadd.f32 %v3887_v13, %v5003_v58  ;;  %v1327_v29 = vmax.f32 %v1261_v17, 0.0 }
 0x2a2   : > { %v1263_v22 = vpop.f32.mrf.mxu1 }
 0x2a3   : > { %v1264_v25 = vadd.f32 %v5003_v58, %v1263_v22  ;;  %v1330_v27 = vmax.f32 %v1272_v18, 0.0 }
 0x2a5   : > { %v1328_v31 = vmax.f32 %v1264_v25, 0.0  ;;  %v1350_v36 = vpack.c.bf16 %v1330_v27, %v1329_v34 }
 0x2a7   : > { %v1349_v35 = vpack.c.bf16 %v1328_v31, %v1327_v29 }
 0x2a9   : > { %3932 = vmatprep.mubr.bf16.mxu1 %v1349_v35  ;;  %v622_v35 = vsub.s32 1, %v4901_v42 }
 0x2aa   : > { %3933 = vmatmul.mubr.bf16.gmra.mxu1 %v1350_v36 }
 0x2ab   : > { %v5039_v36 = vrot.slane %v4904_v44, %v622_v35 }
 0x2ac   : > { %v3890_v39 = vpop.f32.mrf.mxu1 }
 0x2ad   : > { %v1285_v53 = vadd.f32 %v3890_v39, %v5003_v58  ;;  %v5044_v39 = vld [vmem:[%s5493_s6] ss:$0 sm:$0xff]  ;;  %v853_v42 = vadd.f32 %v4919_v61, %v5039_v36 }
 0x2ae   : > { %v1276_v41 = vpop.f32.mrf.mxu1 }
 0x2af   : > { %v1277_v48 = vadd.f32 %v5003_v58, %v1276_v41  ;;  %v1333_v2 = vmax.f32 %v1285_v53, 0.0  ;;  %v839_v41 = vadd.f32 %v4909_v47, %v5039_v36 }
 0x2b0   : > { %v3891_v46 = vpop.f32.mrf.mxu1 }
 0x2b1   : > { %v1288_v49 = vadd.f32 %v3891_v46, %v5003_v58  ;;  %v1331_v63 = vmax.f32 %v1277_v48, 0.0 }
 0x2b2   : > { %v1279_v54 = vpop.f32.mrf.mxu1 }
 0x2b3   : > { %v1280_v55 = vadd.f32 %v5003_v58, %v1279_v54  ;;  %v1334_v60 = vmax.f32 %v1288_v49, 0.0 }
 0x2b5   : > { %v1332_v0 = vmax.f32 %v1280_v55, 0.0  ;;  %v1352_v6 = vpack.c.bf16 %v1334_v60, %v1333_v2  ;;  %v996_v55 = vmax.f32 %v839_v41, 0.0 }
 0x2b7   : > { %v1351_v5 = vpack.c.bf16 %v1332_v0, %v1331_v63  ;;  %v843_v63 = vadd.f32 %v4913_v52, %v5039_v36 }
 0x2b9   : > { %3936 = vmatprep.mubr.bf16.mxu1 %v1351_v5  ;;  %v1002_v5 = vmax.f32 %v853_v42, 0.0  ;;  %v998_v61 = vmax.f32 %v843_v63, 0.0 }
 0x2ba   : > { %3937 = vmatmul.mubr.bf16.gmra.mxu1 %v1352_v6 }
 0x2bc   : > { %v3894_v7 = vpop.f32.mrf.mxu1 }
 0x2bd   : > { %v1301_v17 = vadd.f32 %v3894_v7, %v5003_v58 }
 0x2be   : > { %v1292_v45 = vpop.f32.mrf.mxu1 }
 0x2bf   : > { %v1293_v12 = vadd.f32 %v5003_v58, %v1292_v45  ;;  %v1337_v29 = vmax.f32 %v1301_v17, 0.0 }
 0x2c0   : > { %v3895_v11 = vpop.f32.mrf.mxu1 }
 0x2c1   : > { %v1304_v13 = vadd.f32 %v3895_v11, %v5003_v58  ;;  %v1335_v25 = vmax.f32 %v1293_v12, 0.0 }
 0x2c2   : > { %v1295_v18 = vpop.f32.mrf.mxu1 }
 0x2c3   : > { %v1296_v21 = vadd.f32 %v5003_v58, %v1295_v18  ;;  %v1338_v22 = vmax.f32 %v1304_v13, 0.0  ;;  %v849_v58 = vadd.f32 %v4915_v57, %v5039_v36  ;;  %v869_v18 = vadd.f32 %v4927_v14, %v5039_v36 }
 0x2c4   : > { %v863_v14 = vadd.f32 %v4925_v8, %v5039_v36 }
 0x2c5   : > { %v1336_v27 = vmax.f32 %v1296_v21, 0.0  ;;  %v1354_v34 = vpack.c.bf16 %v1338_v22, %v1337_v29  ;;  %v1000_v53 = vmax.f32 %v849_v58, 0.0  ;;  %v859_v21 = vadd.f32 %v4921_v3, %v5039_v36 }
 0x2c6   : > { %v1008_v29 = vmax.f32 %v869_v18, 0.0 }
 0x2c7   : > { %v1353_v31 = vpack.c.bf16 %v1336_v27, %v1335_v25  ;;  %v1004_v58 = vmax.f32 %v859_v21, 0.0 }
 0x2c9   : > { %3940 = vmatprep.mubr.bf16.mxu1 %v1353_v31  ;;  %v873_v31 = vadd.f32 %v4931_v19, %v5039_v36  ;;  %v1006_v19 = vmax.f32 %v863_v14, 0.0 }
 0x2ca   : > { %3941 = vmatmul.mubr.bf16.gmra.mxu1 %v1354_v34 }
 0x31a   : > { %v3914_v46 = vpop.f32.mrf.mxu1 }
 0x31b   : > { %v1469_v48 = vadd.f32 %v3914_v46, %v5044_v39 }
 0x31c   : > { %v1460_v49 = vpop.f32.mrf.mxu1 }
 0x31d   : > { %v1589_v44 = vmax.f32 %v1469_v48, 0.0  ;;  %v1461_v54 = vadd.f32 %v5044_v39, %v1460_v49 }
 0x31e   : > { %v3915_v60 = vpop.f32.mrf.mxu1 }
 0x31f   : > { %v1621_v57 = vadd.f32 %v1589_v44, %v1000_v53  ;;  %v1587_v0 = vmax.f32 %v1461_v54, 0.0  ;;  %v1472_v47 = vadd.f32 %v3915_v60, %v5044_v39  ;;  %v1010_v53 = vmax.f32 %v873_v31, 0.0 }
 0x320   : > { %v1463_v2 = vpop.f32.mrf.mxu1 }
 0x321   : > { %1653 = vst [vmem:[#allocation3 + $0xe8] sm:$0xff] %v1621_v57  ;;  %v1619_v6 = vadd.f32 %v1587_v0, %v996_v55  ;;  %v1590_v7 = vmax.f32 %v1472_v47, 0.0  ;;  %v1464_v45 = vadd.f32 %v5044_v39, %v1463_v2  ;;  %v889_v0 = vadd.f32 %v4939_v33, %v5039_v36 }
 0x322   : > { %v879_v47 = vadd.f32 %v4933_v24, %v5039_v36  ;;  %v883_v33 = vadd.f32 %v4937_v28, %v5039_v36 }
 0x323   : > { %1651 = vst [vmem:[#allocation3 + $0x80] sm:$0xff] %v1619_v6  ;;  %v1622_v11 = vadd.f32 %v1590_v7, %v1002_v5  ;;  %v1588_v12 = vmax.f32 %v1464_v45, 0.0  ;;  %v1016_v7 = vmax.f32 %v889_v0, 0.0  ;;  %v893_v45 = vadd.f32 %v4943_v37, %v5039_v36 }
 0x324   : > { %v1014_v37 = vmax.f32 %v883_v33, 0.0  ;;  %v933_v33 = vadd.f32 %v4967_v20, %v5039_v36 }
 0x325   : > { %1654 = vst [vmem:[#allocation3 + $0x78] sm:$0xff] %v1622_v11  ;;  %v3546_v13 = vpack.c.bf16 %v1622_v11, %v1621_v57  ;;  %v1620_v17 = vadd.f32 %v1588_v12, %v998_v61  ;;  %v1012_v12 = vmax.f32 %v879_v47, 0.0  ;;  %v1018_v21 = vmax.f32 %v893_v45, 0.0 }
 0x326   : > { %v919_v45 = vadd.f32 %v4957_v4, %v5039_v36 }
 0x327   : > { %3698 = vst [vmem:[#allocation4 + $0x8] sm:$0xff] %v3546_v13   ;;  %1652 = vst [vmem:[#allocation3 + $0xc8] sm:$0xff] %v1620_v17  ;;  %v3541_v52 = vpack.c.bf16 %v1620_v17, %v1619_v6 }
 0x329   : > { %3542 = vst [vmem:[#allocation4] sm:$0xff] %v3541_v52  }
 0x32a   : > { %v3918_v22 = vpop.f32.mrf.mxu1 }
 0x32b   : > { %v1485_v25 = vadd.f32 %v3918_v22, %v5044_v39 }
 0x32c   : > { %v1476_v27 = vpop.f32.mrf.mxu1 }
 0x32d   : > { %v1593_v34 = vmax.f32 %v1485_v25, 0.0  ;;  %v1477_v35 = vadd.f32 %v5044_v39, %v1476_v27 }
 0x32e   : > { %v3919_v41 = vpop.f32.mrf.mxu1 }
 0x32f   : > { %v1625_v46 = vadd.f32 %v1593_v34, %v1008_v29  ;;  %v1591_v48 = vmax.f32 %v1477_v35, 0.0  ;;  %v1488_v3 = vadd.f32 %v3919_v41, %v5044_v39  ;;  %v899_v41 = vadd.f32 %v4945_v43, %v5039_v36 }
 0x330   : > { %v1479_v49 = vpop.f32.mrf.mxu1 }
 0x331   : > { %1657 = vst [vmem:[#allocation3 + $0x58] sm:$0xff] %v1625_v46  ;;  %v1623_v42 = vadd.f32 %v1591_v48, %v1004_v58  ;;  %v1594_v44 = vmax.f32 %v1488_v3, 0.0  ;;  %v1480_v54 = vadd.f32 %v5044_v39, %v1479_v49  ;;  %v909_v58 = vadd.f32 %v4951_v56, %v5039_v36 }
 0x332   : > { %v913_v49 = vadd.f32 %v4955_v62, %v5039_v36  ;;  %v903_v56 = vadd.f32 %v4949_v50, %v5039_v36 }
 0x333   : > { %1655 = vst [vmem:[#allocation3 + $0x8] sm:$0xff] %v1623_v42  ;;  %v1626_v55 = vadd.f32 %v1594_v44, %v1010_v53  ;;  %v1592_v60 = vmax.f32 %v1480_v54, 0.0  ;;  %v1024_v3 = vmax.f32 %v909_v58, 0.0  ;;  %v1020_v44 = vmax.f32 %v899_v41, 0.0 }
 0x334   : > { %v1022_v62 = vmax.f32 %v903_v56, 0.0  ;;  %v949_v41 = vadd.f32 %v4975_v40, %v5039_v36  ;;  %v943_v40 = vadd.f32 %v4973_v32, %v5039_v36 }
 0x335   : > { %1658 = vst [vmem:[#allocation3 + $0xa8] sm:$0xff] %v1626_v55  ;;  %v3556_v63 = vpack.c.bf16 %v1626_v55, %v1625_v46  ;;  %v1624_v57 = vadd.f32 %v1592_v60, %v1006_v19 }
 0x337   : > { %3700 = vst [vmem:[#allocation4 + $0x18] sm:$0xff] %v3556_v63   ;;  %1656 = vst [vmem:[#allocation3 + $0x90] sm:$0xff] %v1624_v57  ;;  %v3551_v8 = vpack.c.bf16 %v1624_v57, %v1623_v42  ;;  %v1026_v63 = vmax.f32 %v913_v49, 0.0  ;;  %v1040_v49 = vmax.f32 %v949_v41, 0.0 }
 0x339   : > { %3699 = vst [vmem:[#allocation4 + $0x10] sm:$0xff] %v3551_v8  }
 0x33a   : > { %v3922_v2 = vpop.f32.mrf.mxu1 }
 0x33b   : > { %v1501_v5 = vadd.f32 %v3922_v2, %v5044_v39 }
 0x33c   : > { %v1492_v6 = vpop.f32.mrf.mxu1 }
 0x33d   : > { %v1597_v61 = vmax.f32 %v1501_v5, 0.0  ;;  %v1493_v11 = vadd.f32 %v5044_v39, %v1492_v6 }
 0x33e   : > { %v3923_v13 = vpop.f32.mrf.mxu1 }
 0x33f   : > { %v1629_v17 = vadd.f32 %v1597_v61, %v1016_v7  ;;  %v1595_v52 = vmax.f32 %v1493_v11, 0.0  ;;  %v1504_v24 = vadd.f32 %v3923_v13, %v5044_v39  ;;  %v929_v7 = vadd.f32 %v4963_v15, %v5039_v36 }
 0x340   : > { %v1495_v18 = vpop.f32.mrf.mxu1  ;;  %v923_v15 = vadd.f32 %v4961_v9, %v5039_v36 }
 0x341   : > { %1661 = vst [vmem:[#allocation3 + $0x38] sm:$0xff] %v1629_v17  ;;  %v1627_v22 = vadd.f32 %v1595_v52, %v1012_v12  ;;  %v1598_v25 = vmax.f32 %v1504_v24, 0.0  ;;  %v1496_v27 = vadd.f32 %v5044_v39, %v1495_v18  ;;  %v1032_v13 = vmax.f32 %v929_v7, 0.0 }
 0x342   : > { %v1028_v24 = vmax.f32 %v919_v45, 0.0  ;;  %v1030_v20 = vmax.f32 %v923_v15, 0.0 }
 0x343   : > { %1659 = vst [vmem:[#allocation3 + $0xd0] sm:$0xff] %v1627_v22  ;;  %v1630_v29 = vadd.f32 %v1598_v25, %v1018_v21  ;;  %v1596_v31 = vmax.f32 %v1496_v27, 0.0  ;;  %v1034_v27 = vmax.f32 %v933_v33, 0.0 }
 0x345   : > { %1662 = vst [vmem:[#allocation3 + $0x40] sm:$0xff] %v1630_v29  ;;  %v3566_v34 = vpack.c.bf16 %v1630_v29, %v1629_v17  ;;  %v1628_v35 = vadd.f32 %v1596_v31, %v1014_v37 }
 0x347   : > { %3702 = vst [vmem:[#allocation4 + $0x28] sm:$0xff] %v3566_v34   ;;  %1660 = vst [vmem:[#allocation3 + $0xb0] sm:$0xff] %v1628_v35  ;;  %v3561_v28 = vpack.c.bf16 %v1628_v35, %v1627_v22 }
 0x349   : > { %3701 = vst [vmem:[#allocation4 + $0x20] sm:$0xff] %v3561_v28  }
 0x34a   : > { %v3926_v14 = vpop.f32.mrf.mxu1 }
 0x34b   : > { %v1517_v46 = vadd.f32 %v3926_v14, %v5044_v39  ;;  %v939_v14 = vadd.f32 %v4969_v26, %v5039_v36 }
 0x34c   : > { %v1508_v48 = vpop.f32.mrf.mxu1 }
 0x34d   : > { %v1601_v53 = vmax.f32 %v1517_v46, 0.0  ;;  %v1509_v42 = vadd.f32 %v5044_v39, %v1508_v48 }
 0x34e   : > { %v3927_v54 = vpop.f32.mrf.mxu1 }
 0x34f   : > { %v1633_v19 = vadd.f32 %v1601_v53, %v1024_v3  ;;  %v1599_v55 = vmax.f32 %v1509_v42, 0.0  ;;  %v1520_v43 = vadd.f32 %v3927_v54, %v5044_v39  ;;  %v953_v53 = vadd.f32 %v4979_v51, %v5039_v36 }
 0x350   : > { %v1511_v60 = vpop.f32.mrf.mxu1  ;;  %v1036_v54 = vmax.f32 %v939_v14, 0.0  ;;  %v1038_v51 = vmax.f32 %v943_v40, 0.0 }
 0x351   : > { %1665 = vst [vmem:[#allocation3 + $0x18] sm:$0xff] %v1633_v19  ;;  %v1631_v57 = vadd.f32 %v1599_v55, %v1020_v44  ;;  %v1602_v8 = vmax.f32 %v1520_v43, 0.0  ;;  %v1512_v0 = vadd.f32 %v5044_v39, %v1511_v60  ;;  %v1042_v60 = vmax.f32 %v953_v53, 0.0 }
 0x353   : > { %1663 = vst [vmem:[#allocation3 + $0xe0] sm:$0xff] %v1631_v57  ;;  %v1634_v47 = vadd.f32 %v1602_v8, %v1026_v63  ;;  %v1600_v2 = vmax.f32 %v1512_v0, 0.0 }
 0x355   : > { %1666 = vst [vmem:[#allocation3 + $0x68] sm:$0xff] %v1634_v47  ;;  %v3576_v5 = vpack.c.bf16 %v1634_v47, %v1633_v19  ;;  %v1632_v6 = vadd.f32 %v1600_v2, %v1022_v62 }
 0x357   : > { %3704 = vst [vmem:[#allocation4 + $0x38] sm:$0xff] %v3576_v5   ;;  %1664 = vst [vmem:[#allocation3 + $0x60] sm:$0xff] %v1632_v6  ;;  %v3571_v50 = vpack.c.bf16 %v1632_v6, %v1631_v57  ;;  %v969_v5 = vadd.f32 %v4987_v10, %v5039_v36  ;;  %v959_v6 = vadd.f32 %v4981_v59, %v5039_v36 }
 0x358   : > { %v963_v10 = vadd.f32 %v4985_v1, %v5039_v36 }
 0x359   : > { %3703 = vst [vmem:[#allocation4 + $0x30] sm:$0xff] %v3571_v50   ;;  %v1044_v33 = vmax.f32 %v959_v6, 0.0 }
 0x35a   : > { %v3930_v61 = vpop.f32.mrf.mxu1 }
 0x35b   : > { %v1533_v11 = vadd.f32 %v3930_v61, %v5044_v39  ;;  %v1048_v61 = vmax.f32 %v969_v5, 0.0 }
 0x35c   : > { %v1524_v12 = vpop.f32.mrf.mxu1 }
 0x35d   : > { %v1605_v17 = vmax.f32 %v1533_v11, 0.0  ;;  %v1525_v52 = vadd.f32 %v5044_v39, %v1524_v12  ;;  %v973_v11 = vadd.f32 %v4991_v16, %v5039_v36  ;;  %v1046_v16 = vmax.f32 %v963_v10, 0.0 }
 0x35e   : > { %v3931_v18 = vpop.f32.mrf.mxu1 }
 0x35f   : > { %v1637_v21 = vadd.f32 %v1605_v17, %v1032_v13  ;;  %v1603_v22 = vmax.f32 %v1525_v52, 0.0  ;;  %v1536_v4 = vadd.f32 %v3931_v18, %v5044_v39  ;;  %v1050_v15 = vmax.f32 %v973_v11, 0.0 }
 0x360   : > { %v1527_v25 = vpop.f32.mrf.mxu1 }
 0x361   : > { %1669 = vst [vmem:[#allocation3 + $0x50] sm:$0xff] %v1637_v21  ;;  %v1635_v37 = vadd.f32 %v1603_v22, %v1028_v24  ;;  %v1606_v29 = vmax.f32 %v1536_v4, 0.0  ;;  %v1528_v31 = vadd.f32 %v5044_v39, %v1527_v25 }
 0x363   : > { %1667 = vst [vmem:[#allocation3 + $0x10] sm:$0xff] %v1635_v37  ;;  %v1638_v34 = vadd.f32 %v1606_v29, %v1034_v27  ;;  %v1604_v35 = vmax.f32 %v1528_v31, 0.0  ;;  %v989_v31 = vadd.f32 %v4999_v38, %v5039_v36  ;;  %v983_v38 = vadd.f32 %v4997_v30, %v5039_v36 }
 0x365   : > { %1670 = vst [vmem:[#allocation3 + $0xa0] sm:$0xff] %v1638_v34  ;;  %v3586_v28 = vpack.c.bf16 %v1638_v34, %v1637_v21  ;;  %v1636_v58 = vadd.f32 %v1604_v35, %v1030_v20  ;;  %v979_v20 = vadd.f32 %v4993_v23, %v5039_v36  ;;  %v992_v34 = vpop.f32.mrf.mxu0 }
 0x366   : > { %v993_v41 = vadd.f32 %v992_v34, %v5039_v36 }
 0x367   : > { %3706 = vst [vmem:[#allocation4 + $0x48] sm:$0xff] %v3586_v28   ;;  %1668 = vst [vmem:[#allocation3 + $0x70] sm:$0xff] %v1636_v58  ;;  %v3581_v9 = vpack.c.bf16 %v1636_v58, %v1635_v37 }
 0x369   : > { %3705 = vst [vmem:[#allocation4 + $0x40] sm:$0xff] %v3581_v9   ;;  %v1056_v9 = vmax.f32 %v989_v31, 0.0 }
 0x36a   : > { %v3934_v46 = vpop.f32.mrf.mxu1 }
 0x36b   : > { %v1549_v48 = vadd.f32 %v3934_v46, %v5044_v39 }
 0x36c   : > { %v1540_v3 = vpop.f32.mrf.mxu1 }
 0x36d   : > { %v1609_v42 = vmax.f32 %v1549_v48, 0.0  ;;  %v1541_v44 = vadd.f32 %v5044_v39, %v1540_v3  ;;  %v1052_v48 = vmax.f32 %v979_v20, 0.0 }
 0x36e   : > { %v3935_v56 = vpop.f32.mrf.mxu1 }
 0x36f   : > { %v1641_v19 = vadd.f32 %v1609_v42, %v1040_v49  ;;  %v1607_v55 = vmax.f32 %v1541_v44, 0.0  ;;  %v1552_v26 = vadd.f32 %v3935_v56, %v5044_v39  ;;  %v1058_v44 = vmax.f32 %v993_v41, 0.0 }
 0x370   : > { %v1543_v43 = vpop.f32.mrf.mxu1 }
 0x371   : > { %1673 = vst [vmem:[#allocation3 + $0x20] sm:$0xff] %v1641_v19  ;;  %v1639_v63 = vadd.f32 %v1607_v55, %v1036_v54  ;;  %v1610_v57 = vmax.f32 %v1552_v26, 0.0  ;;  %v1544_v8 = vadd.f32 %v5044_v39, %v1543_v43 }
 0x373   : > { %1671 = vst [vmem:[#allocation3 + $0xd8] sm:$0xff] %v1639_v63  ;;  %v1642_v0 = vadd.f32 %v1610_v57, %v1042_v60  ;;  %v1608_v62 = vmax.f32 %v1544_v8, 0.0 }
 0x375   : > { %1674 = vst [vmem:[#allocation3 + $0xf0] sm:$0xff] %v1642_v0  ;;  %v3596_v47 = vpack.c.bf16 %v1642_v0, %v1641_v19  ;;  %v1640_v2 = vadd.f32 %v1608_v62, %v1038_v51  ;;  %v1054_v19 = vmax.f32 %v983_v38, 0.0 }
 0x377   : > { %3708 = vst [vmem:[#allocation4 + $0x58] sm:$0xff] %v3596_v47   ;;  %1672 = vst [vmem:[#allocation3 + $0x30] sm:$0xff] %v1640_v2  ;;  %v3591_v32 = vpack.c.bf16 %v1640_v2, %v1639_v63 }
 0x379   : > { %3707 = vst [vmem:[#allocation4 + $0x50] sm:$0xff] %v3591_v32  }
 0x37a   : > { %v3938_v50 = vpop.f32.mrf.mxu1 }
 0x37b   : > { %v1565_v7 = vadd.f32 %v3938_v50, %v5044_v39 }
 0x37c   : > { %v1556_v45 = vpop.f32.mrf.mxu1 }
 0x37d   : > { %v1613_v12 = vmax.f32 %v1565_v7, 0.0  ;;  %v1557_v13 = vadd.f32 %v5044_v39, %v1556_v45 }
 0x37e   : > { %v3939_v17 = vpop.f32.mrf.mxu1 }
 0x37f   : > { %v1645_v52 = vadd.f32 %v1613_v12, %v1048_v61  ;;  %v1611_v24 = vmax.f32 %v1557_v13, 0.0  ;;  %v1568_v59 = vadd.f32 %v3939_v17, %v5044_v39 }
 0x380   : > { %v1559_v18 = vpop.f32.mrf.mxu1 }
 0x381   : > { %1677 = vst [vmem:[#allocation3 + $0xf8] sm:$0xff] %v1645_v52  ;;  %v1643_v21 = vadd.f32 %v1611_v24, %v1044_v33  ;;  %v1614_v22 = vmax.f32 %v1568_v59, 0.0  ;;  %v1560_v4 = vadd.f32 %v5044_v39, %v1559_v18 }
 0x383   : > { %1675 = vst [vmem:[#allocation3 + $0x88] sm:$0xff] %v1643_v21  ;;  %v1646_v25 = vadd.f32 %v1614_v22, %v1050_v15  ;;  %v1612_v27 = vmax.f32 %v1560_v4, 0.0 }
 0x385   : > { %1678 = vst [vmem:[#allocation3 + $0xc0] sm:$0xff] %v1646_v25  ;;  %v3606_v37 = vpack.c.bf16 %v1646_v25, %v1645_v52  ;;  %v1644_v29 = vadd.f32 %v1612_v27, %v1046_v16 }
 0x387   : > { %3710 = vst [vmem:[#allocation4 + $0x68] sm:$0xff] %v3606_v37   ;;  %1676 = vst [vmem:[#allocation3 + $0x48] sm:$0xff] %v1644_v29  ;;  %v3601_v1 = vpack.c.bf16 %v1644_v29, %v1643_v21 }
 0x389   : > { %3709 = vst [vmem:[#allocation4 + $0x60] sm:$0xff] %v3601_v1  }
 0x38a   : > { %v3942_v35 = vpop.f32.mrf.mxu1 }
 0x38b   : > { %v1581_v28 = vadd.f32 %v3942_v35, %v5044_v39 }
 0x38c   : > { %v1572_v58 = vpop.f32.mrf.mxu1 }
 0x38d   : > { %v1617_v14 = vmax.f32 %v1581_v28, 0.0  ;;  %v1573_v46 = vadd.f32 %v5044_v39, %v1572_v58 }
 0x38e   : > { %v3943_v3 = vpop.f32.mrf.mxu1 }
 0x38f   : > { %v1649_v49 = vadd.f32 %v1617_v14, %v1056_v9  ;;  %v1615_v53 = vmax.f32 %v1573_v46, 0.0  ;;  %v1584_v23 = vadd.f32 %v3943_v3, %v5044_v39 }
 0x390   : > { %v1575_v42 = vpop.f32.mrf.mxu1 }
 0x391   : > { %1681 = vst [vmem:[#allocation3 + $0x28] sm:$0xff] %v1649_v49  ;;  %v1647_v54 = vadd.f32 %v1615_v53, %v1052_v48  ;;  %v1618_v56 = vmax.f32 %v1584_v23, 0.0  ;;  %v1576_v40 = vadd.f32 %v5044_v39, %v1575_v42 }
 0x393   : > { %1679 = vst [vmem:[#allocation3 + $0xb8] sm:$0xff] %v1647_v54  ;;  %v1650_v55 = vadd.f32 %v1618_v56, %v1058_v44  ;;  %v1616_v26 = vmax.f32 %v1576_v40, 0.0 }
 0x395   : > { %1682 = vst [vmem:[#allocation3 + $0x98] sm:$0xff] %v1650_v55  ;;  %v3616_v43 = vpack.c.bf16 %v1650_v55, %v1649_v49  ;;  %v1648_v60 = vadd.f32 %v1616_v26, %v1054_v19 }
 0x397   : > { %3712 = vst [vmem:[#allocation4 + $0x78] sm:$0xff] %v3616_v43   ;;  %1680 = vst [vmem:[#allocation3] sm:$0xff] %v1648_v60  ;;  %v3611_v30 = vpack.c.bf16 %v1648_v60, %v1647_v54 }
 0x399   : > { %3711 = vst [vmem:[#allocation4 + $0x70] sm:$0xff] %v3611_v30  }
 0x39a PF: > { %p3386_p8 = scmp.le.s32.totalorder %s4625_s25, 0 }
 0x39c   : > { %1846 = sbr.rel (%p3386_p8) target bundleno = 957 (0x3bd), region = 116 }
 0x3a1   : > { %v1847_v36 = vld [vmem:[#allocation2 + $0xb0] sm:$0xff]  ;;  %v1848_v63 = vld [vmem:[#allocation2] sm:$0xff]  ;;  %v1880_v8 = vld [vmem:[#allocation3 + $0xc8] sm:$0xff] }
 0x3a2   : > { %v1879_v57 = vld [vmem:[#allocation3 + $0x80] sm:$0xff]  ;;  %v1849_v51 = vld [vmem:[#allocation2 + $0xd8] sm:$0xff]  ;;  %v1912_v62 = vadd.f32 %v1880_v8, %v1848_v63  ;;  %v1881_v47 = vld [vmem:[#allocation3 + $0xe8] sm:$0xff] }
 0x3a3   : > { %v1911_v39 = vadd.f32 %v1879_v57, %v1847_v36  ;;  %v1850_v0 = vld [vmem:[#allocation2 + $0x18] sm:$0xff]  ;;  %v1851_v32 = vld [vmem:[#allocation2 + $0x50] sm:$0xff]  ;;  %v1913_v5 = vadd.f32 %v1881_v47, %v1849_v51  ;;  %v1852_v50 = vld [vmem:[#allocation2 + $0x68] sm:$0xff] }
 0x3a4   : > { %v1882_v2 = vld [vmem:[#allocation3 + $0x78] sm:$0xff]  ;;  %v1883_v7 = vld [vmem:[#allocation3 + $0x8] sm:$0xff]  ;;  %v1884_v45 = vld [vmem:[#allocation3 + $0x90] sm:$0xff] }
 0x3a5   : > { %v1914_v6 = vadd.f32 %v1882_v2, %v1850_v0  ;;  %v3621_v61 = vpack.c.bf16 %v1912_v62, %v1911_v39  ;;  %v1915_v11 = vadd.f32 %v1883_v7, %v1851_v32  ;;  %v1916_v12 = vadd.f32 %v1884_v45, %v1852_v50  ;;  %v1853_v13 = vld [vmem:[#allocation2 + $0x30] sm:$0xff]  ;;  %v1854_v33 = vld [vmem:[#allocation2 + $0x48] sm:$0xff]  ;;  %v1885_v17 = vld [vmem:[#allocation3 + $0x58] sm:$0xff] }
 0x3a6   : > { %v1886_v52 = vld [vmem:[#allocation3 + $0xa8] sm:$0xff]  ;;  %v1917_v24 = vadd.f32 %v1885_v17, %v1853_v13  ;;  %v1855_v59 = vld [vmem:[#allocation2 + $0x80] sm:$0xff]  ;;  %v1887_v22 = vld [vmem:[#allocation3 + $0xd0] sm:$0xff] }
 0x3a7   : > { %v3626_v10 = vpack.c.bf16 %v1914_v6, %v1913_v5  ;;  %v1856_v18 = vld [vmem:[#allocation2 + $0x88] sm:$0xff]  ;;  %3622 = vst [vmem:[#allocation4] sm:$0xff] %v3621_v61   ;;  %v3631_v15 = vpack.c.bf16 %v1916_v12, %v1915_v11  ;;  %v1918_v21 = vadd.f32 %v1886_v52, %v1854_v33  ;;  %v1888_v4 = vld [vmem:[#allocation3 + $0xb0] sm:$0xff]  ;;  %v1919_v25 = vadd.f32 %v1887_v22, %v1855_v59  ;;  %v1858_v37 = vld [vmem:[#allocation2 + $0xb8] sm:$0xff] }
 0x3a8   : > { %v1857_v16 = vld [vmem:[#allocation2 + $0xe8] sm:$0xff]  ;;  %v1920_v27 = vadd.f32 %v1888_v4, %v1856_v18  ;;  %v1889_v29 = vld [vmem:[#allocation3 + $0x38] sm:$0xff]  ;;  %v1890_v1 = vld [vmem:[#allocation3 + $0x40] sm:$0xff] }
 0x3a9   : > { %3713 = vst [vmem:[#allocation4 + $0x8] sm:$0xff] %v3626_v10   ;;  %3714 = vst [vmem:[#allocation4 + $0x10] sm:$0xff] %v3631_v15   ;;  %v3636_v31 = vpack.c.bf16 %v1918_v21, %v1917_v24  ;;  %v1921_v20 = vadd.f32 %v1889_v29, %v1857_v16  ;;  %v1922_v34 = vadd.f32 %v1890_v1, %v1858_v37  ;;  %v1859_v35 = vld [vmem:[#allocation2 + $0x60] sm:$0xff]  ;;  %v1860_v28 = vld [vmem:[#allocation2 + $0xf0] sm:$0xff] }
 0x3aa   : > { %v1891_v58 = vld [vmem:[#allocation3 + $0xe0] sm:$0xff]  ;;  %v3641_v9 = vpack.c.bf16 %v1920_v27, %v1919_v25  ;;  %v1861_v46 = vld [vmem:[#allocation2 + $0x8] sm:$0xff]  ;;  %v1862_v48 = vld [vmem:[#allocation2 + $0x78] sm:$0xff] }
 0x3ab   : > { %v1892_v41 = vld [vmem:[#allocation3 + $0x60] sm:$0xff]  ;;  %v1923_v14 = vadd.f32 %v1891_v58, %v1859_v35  ;;  %3715 = vst [vmem:[#allocation4 + $0x18] sm:$0xff] %v3636_v31   ;;  %v3646_v3 = vpack.c.bf16 %v1922_v34, %v1921_v20  ;;  %v1893_v49 = vld [vmem:[#allocation3 + $0x18] sm:$0xff]  ;;  %v1894_v53 = vld [vmem:[#allocation3 + $0x68] sm:$0xff] }
 0x3ac   : > { %v1924_v38 = vadd.f32 %v1892_v41, %v1860_v28  ;;  %v1863_v23 = vld [vmem:[#allocation2 + $0x38] sm:$0xff]  ;;  %3716 = vst [vmem:[#allocation4 + $0x20] sm:$0xff] %v3641_v9   ;;  %v1925_v42 = vadd.f32 %v1893_v49, %v1861_v46  ;;  %v1926_v44 = vadd.f32 %v1894_v53, %v1862_v48  ;;  %v1895_v56 = vld [vmem:[#allocation3 + $0x10] sm:$0xff]  ;;  %v1865_v43 = vld [vmem:[#allocation2 + $0x40] sm:$0xff] }
 0x3ad   : > { %v1864_v54 = vld [vmem:[#allocation2 + $0x58] sm:$0xff]  ;;  %v1896_v40 = vld [vmem:[#allocation3 + $0x70] sm:$0xff]  ;;  %3717 = vst [vmem:[#allocation4 + $0x28] sm:$0xff] %v3646_v3   ;;  %v1927_v55 = vadd.f32 %v1895_v56, %v1863_v23  ;;  %v1866_v60 = vld [vmem:[#allocation2 + $0xc8] sm:$0xff] }
 0x3ae   : > { %v3651_v19 = vpack.c.bf16 %v1924_v38, %v1923_v14  ;;  %v1928_v26 = vadd.f32 %v1896_v40, %v1864_v54  ;;  %v1897_v30 = vld [vmem:[#allocation3 + $0x50] sm:$0xff]  ;;  %v3656_v36 = vpack.c.bf16 %v1926_v44, %v1925_v42  ;;  %v1898_v63 = vld [vmem:[#allocation3 + $0xa0] sm:$0xff]  ;;  %v1899_v62 = vld [vmem:[#allocation3 + $0xd8] sm:$0xff] }
 0x3af   : > { %v1929_v57 = vadd.f32 %v1897_v30, %v1865_v43  ;;  %v1867_v8 = vld [vmem:[#allocation2 + $0xe0] sm:$0xff]  ;;  %v1868_v39 = vld [vmem:[#allocation2 + $0x90] sm:$0xff]  ;;  %v1930_v0 = vadd.f32 %v1898_v63, %v1866_v60  ;;  %v1871_v12 = vld [vmem:[#allocation2 + $0xa8] sm:$0xff] }
 0x3b0   : > { %3718 = vst [vmem:[#allocation4 + $0x30] sm:$0xff] %v3651_v19   ;;  %v3661_v51 = vpack.c.bf16 %v1928_v26, %v1927_v55  ;;  %v1900_v47 = vld [vmem:[#allocation3 + $0x30] sm:$0xff]  ;;  %3719 = vst [vmem:[#allocation4 + $0x38] sm:$0xff] %v3656_v36   ;;  %v1931_v32 = vadd.f32 %v1899_v62, %v1867_v8  ;;  %v1870_v6 = vld [vmem:[#allocation2 + $0xc0] sm:$0xff] }
 0x3b1   : > { %v1869_v2 = vld [vmem:[#allocation2 + $0x70] sm:$0xff]  ;;  %v1932_v5 = vadd.f32 %v1900_v47, %v1868_v39  ;;  %v1901_v50 = vld [vmem:[#allocation3 + $0x20] sm:$0xff]  ;;  %v3666_v45 = vpack.c.bf16 %v1930_v0, %v1929_v57  ;;  %v1903_v33 = vld [vmem:[#allocation3 + $0x88] sm:$0xff] }
 0x3b2   : > { %v1902_v7 = vld [vmem:[#allocation3 + $0xf0] sm:$0xff]  ;;  %3720 = vst [vmem:[#allocation4 + $0x40] sm:$0xff] %v3661_v51   ;;  %v1933_v61 = vadd.f32 %v1901_v50, %v1869_v2  ;;  %v1904_v10 = vld [vmem:[#allocation3 + $0x48] sm:$0xff]  ;;  %v1935_v52 = vadd.f32 %v1903_v33, %v1871_v12  ;;  %v1905_v21 = vld [vmem:[#allocation3 + $0xf8] sm:$0xff] }
 0x3b3   : > { %v1934_v11 = vadd.f32 %v1902_v7, %v1870_v6  ;;  %v1872_v13 = vld [vmem:[#allocation2 + $0xd0] sm:$0xff]  ;;  %v3671_v17 = vpack.c.bf16 %v1932_v5, %v1931_v32  ;;  %v1874_v59 = vld [vmem:[#allocation2 + $0x28] sm:$0xff]  ;;  %3721 = vst [vmem:[#allocation4 + $0x48] sm:$0xff] %v3666_v45   ;;  %v1906_v22 = vld [vmem:[#allocation3 + $0xc0] sm:$0xff] }
 0x3b4   : > { %v1873_v24 = vld [vmem:[#allocation2 + $0x10] sm:$0xff]  ;;  %v1936_v15 = vadd.f32 %v1904_v10, %v1872_v13  ;;  %v1875_v4 = vld [vmem:[#allocation2 + $0xa0] sm:$0xff]  ;;  %v1938_v25 = vadd.f32 %v1906_v22, %v1874_v59  ;;  %v1876_v27 = vld [vmem:[#allocation2 + $0xf8] sm:$0xff] }
 0x3b5   : > { %v3676_v18 = vpack.c.bf16 %v1934_v11, %v1933_v61  ;;  %3722 = vst [vmem:[#allocation4 + $0x50] sm:$0xff] %v3671_v17   ;;  %v1937_v16 = vadd.f32 %v1905_v21, %v1873_v24  ;;  %v1907_v37 = vld [vmem:[#allocation3 + $0xb8] sm:$0xff]  ;;  %v1908_v29 = vld [vmem:[#allocation3] sm:$0xff]  ;;  %v1909_v28 = vld [vmem:[#allocation3 + $0x28] sm:$0xff] }
 0x3b6   : > { %v3681_v1 = vpack.c.bf16 %v1936_v15, %v1935_v52  ;;  %v1939_v31 = vadd.f32 %v1907_v37, %v1875_v4  ;;  %v1940_v20 = vadd.f32 %v1908_v29, %v1876_v27  ;;  %v1877_v34 = vld [vmem:[#allocation2 + $0x20] sm:$0xff]  ;;  %v1878_v35 = vld [vmem:[#allocation2 + $0x98] sm:$0xff] }
 0x3b7   : > { %3723 = vst [vmem:[#allocation4 + $0x58] sm:$0xff] %v3676_v18   ;;  %v3686_v58 = vpack.c.bf16 %v1938_v25, %v1937_v16  ;;  %v1910_v9 = vld [vmem:[#allocation3 + $0x98] sm:$0xff]  ;;  %v1941_v41 = vadd.f32 %v1909_v28, %v1877_v34 }
 0x3b8   : > { %3724 = vst [vmem:[#allocation4 + $0x60] sm:$0xff] %v3681_v1   ;;  %v3691_v14 = vpack.c.bf16 %v1940_v20, %v1939_v31  ;;  %v1942_v46 = vadd.f32 %v1910_v9, %v1878_v35 }
 0x3b9   : > { %3725 = vst [vmem:[#allocation4 + $0x68] sm:$0xff] %v3686_v58  }
 0x3ba   : > { %3726 = vst [vmem:[#allocation4 + $0x70] sm:$0xff] %v3691_v14   ;;  %v3696_v48 = vpack.c.bf16 %v1942_v46, %v1941_v41 }
 0x3bc   : > { %3727 = vst [vmem:[#allocation4 + $0x78] sm:$0xff] %v3696_v48  }
 0x3bd PF: > { %s5143_s16 = sshll.u32 %s4625_s25, 6  ;;  %v4297_v3 = vld [vmem:[#allocation4] sm:$0xff]   ;;  %v4298_v55 = vld [vmem:[#allocation4 + $0x8] sm:$0xff]   ;;  %v4299_v43 = vld [vmem:[#allocation4 + $0x10] sm:$0xff]   ;;  %s2122_s29 = scalar_lea.vmem %s5495_s8, %s4625_s25 }
 0x3be   : > { %s5146_s21 = scalar_lea.vmem [#allocation16], %s5143_s16  ;;  %3960 = vmatprep.mubr.bf16.mxu0 %v4297_v3  ;;  %v4305_v44 = vld [vmem:[#allocation4 + $0x40] sm:$0xff]   ;;  %s5156_s28 = scalar_lea.vmem [#allocation17], %s5143_s16  ;;  %v4306_v26 = vld [vmem:[#allocation4 + $0x48] sm:$0xff]   ;;  %v4307_v60 = vld [vmem:[#allocation4 + $0x50] sm:$0xff]  }
 0x3bf   : > { %v4289_v38 = vld [vmem:[%s5146_s21 + $0x38] sm:$0xff]   ;;  %v4290_v49 = vld [vmem:[%s5146_s21 + $0x30] sm:$0xff]   ;;  %v4291_v53 = vld [vmem:[%s5146_s21 + $0x28] sm:$0xff]   ;;  %3976 = vmatprep.mubr.bf16.mxu1 %v4305_v44  ;;  %s5168_s19 = scalar_lea.vmem [#allocation19], %s5143_s16  ;;  %s2142_s1 = scalar_lea.vmem %s5497_s10, %s4625_s25 }
 0x3c0   : > { %3944 = vmatprep.subr.bf16.mxu0 %v4289_v38  ;;  %4088 = vmatprep.subr.bf16.mxu1 %v4289_v38  ;;  %v4292_v23 = vld [vmem:[%s5146_s21 + $0x20] sm:$0xff]   ;;  %v4293_v42 = vld [vmem:[%s5146_s21 + $0x18] sm:$0xff]   ;;  %v4294_v54 = vld [vmem:[%s5146_s21 + $0x10] sm:$0xff]   ;;  %s2162_s14 = scalar_lea.vmem %s5499_s12, %s4625_s25  ;;  %p3466_p9 = scmp.ne.s32.totalorder %s4625_s25, 2 }
 0x3c1   : > { %3945 = vmatpush3.bf16.msra.mxu0 %v4289_v38  ;;  %4096 = vmatpush3.bf16.msra.mxu1 %v4289_v38  ;;  %v4295_v56 = vld [vmem:[%s5146_s21 + $0x8] sm:$0xff]   ;;  %v4296_v40 = vld [vmem:[%s5146_s21] sm:$0xff]   ;;  %v4313_v19 = vld [vmem:[%s5156_s28 + $0x38] sm:$0xff]  }
 0x3c2   : > { %3946 = vmatprep.subr.bf16.mxu0 %v4290_v49  ;;  %4089 = vmatprep.subr.bf16.mxu1 %v4290_v49  ;;  %v4314_v30 = vld [vmem:[%s5156_s28 + $0x30] sm:$0xff]   ;;  %v4315_v36 = vld [vmem:[%s5156_s28 + $0x28] sm:$0xff]   ;;  %v4300_v63 = vld [vmem:[#allocation4 + $0x18] sm:$0xff]  }
 0x3c3   : > { %v4308_v57 = vld [vmem:[#allocation4 + $0x58] sm:$0xff]   ;;  %v4301_v8 = vld [vmem:[#allocation4 + $0x20] sm:$0xff]   ;;  %v4302_v62 = vld [vmem:[#allocation4 + $0x28] sm:$0xff]  }
 0x3c4   : > { %v4309_v39 = vld [vmem:[#allocation4 + $0x60] sm:$0xff]   ;;  %v4317_v0 = vld [vmem:[%s5156_s28 + $0x18] sm:$0xff]   ;;  %v4310_v47 = vld [vmem:[#allocation4 + $0x68] sm:$0xff]  }
 0x3c5   : > { %3947 = vmatpush3.bf16.msra.mxu0 %v4290_v49  ;;  %4097 = vmatpush3.bf16.msra.mxu1 %v4290_v49  ;;  %v4316_v51 = vld [vmem:[%s5156_s28 + $0x20] sm:$0xff]   ;;  %v4303_v2 = vld [vmem:[#allocation4 + $0x30] sm:$0xff]   ;;  %v4304_v5 = vld [vmem:[#allocation4 + $0x38] sm:$0xff]  }
 0x3c6   : > { %3948 = vmatprep.subr.bf16.mxu0 %v4291_v53  ;;  %4090 = vmatprep.subr.bf16.mxu1 %v4291_v53  ;;  %v4311_v32 = vld [vmem:[#allocation4 + $0x70] sm:$0xff]   ;;  %v4312_v6 = vld [vmem:[#allocation4 + $0x78] sm:$0xff]   ;;  %v4319_v7 = vld [vmem:[%s5156_s28 + $0x8] sm:$0xff]  }
 0x3c7   : > { %v4318_v50 = vld [vmem:[%s5156_s28 + $0x10] sm:$0xff]   ;;  %v4320_v45 = vld [vmem:[%s5156_s28] sm:$0xff]   ;;  %v4321_v61 = vld [vmem:[%s5168_s19 + $0x38] sm:$0xff]  }
 0x3c8   : > { %v4322_v11 = vld [vmem:[%s5168_s19 + $0x30] sm:$0xff]   ;;  %v4323_v12 = vld [vmem:[%s5168_s19 + $0x28] sm:$0xff]   ;;  %v4324_v13 = vld [vmem:[%s5168_s19 + $0x20] sm:$0xff]  }
 0x3c9   : > { %3949 = vmatpush3.bf16.msra.mxu0 %v4291_v53  ;;  %4098 = vmatpush3.bf16.msra.mxu1 %v4291_v53  ;;  %v4325_v33 = vld [vmem:[%s5168_s19 + $0x18] sm:$0xff]   ;;  %v5181_v59 = vld [vmem:[%s2122_s29] ss:$0 sm:$0xff] }
 0x3ca   : > { %3950 = vmatprep.subr.bf16.mxu0 %v4292_v23  ;;  %4091 = vmatprep.subr.bf16.mxu1 %v4292_v23 }
 0x3cd   : > { %3951 = vmatpush3.bf16.msra.mxu0 %v4292_v23  ;;  %4099 = vmatpush3.bf16.msra.mxu1 %v4292_v23 }
 0x3ce   : > { %3952 = vmatprep.subr.bf16.mxu0 %v4293_v42  ;;  %4092 = vmatprep.subr.bf16.mxu1 %v4293_v42 }
 0x3d1   : > { %3953 = vmatpush3.bf16.msra.mxu0 %v4293_v42  ;;  %4100 = vmatpush3.bf16.msra.mxu1 %v4293_v42 }
 0x3d2   : > { %3954 = vmatprep.subr.bf16.mxu0 %v4294_v54  ;;  %4093 = vmatprep.subr.bf16.mxu1 %v4294_v54 }
 0x3d5   : > { %3955 = vmatpush3.bf16.msra.mxu0 %v4294_v54  ;;  %4101 = vmatpush3.bf16.msra.mxu1 %v4294_v54 }
 0x3d6   : > { %3956 = vmatprep.subr.bf16.mxu0 %v4295_v56  ;;  %4094 = vmatprep.subr.bf16.mxu1 %v4295_v56 }
 0x3d9   : > { %3957 = vmatpush3.bf16.msra.mxu0 %v4295_v56  ;;  %4102 = vmatpush3.bf16.msra.mxu1 %v4295_v56 }
 0x3da   : > { %3958 = vmatprep.subr.bf16.mxu0 %v4296_v40  ;;  %4095 = vmatprep.subr.bf16.mxu1 %v4296_v40 }
 0x3dd   : > { %3959 = vmatpush3.bf16.msra.mxu0 %v4296_v40  ;;  %4103 = vmatpush3.bf16.msra.mxu1 %v4296_v40 }
 0x3de   : > { %3992 = vmatprep.subr.bf16.mxu1 %v4313_v19  ;;  %4040 = vmatprep.subr.bf16.mxu0 %v4321_v61 }
 0x3e0   : > { %3961 = vmatmul.mubr.bf16.vlgmr.msra.gmra.mxu0 %v4298_v55  ;;  %3977 = vmatmul.mubr.bf16.vlgmr.msra.gmra.mxu1 %v4306_v26 }
 0x3e1   : > { %3964 = vmatprep.mubr.bf16.mxu0 %v4299_v43  ;;  %3980 = vmatprep.mubr.bf16.mxu1 %v4307_v60 }
 0x3e2   : > { %3993 = vmatpush3.bf16.msra.mxu1 %v4313_v19  ;;  %4041 = vmatpush3.bf16.msra.mxu0 %v4321_v61 }
 0x3e3   : > { %3994 = vmatprep.subr.bf16.mxu1 %v4314_v30  ;;  %4042 = vmatprep.subr.bf16.mxu0 %v4322_v11 }
 0x3e6   : > { %3995 = vmatpush3.bf16.msra.mxu1 %v4314_v30  ;;  %4043 = vmatpush3.bf16.msra.mxu0 %v4322_v11 }
 0x3e7   : > { %3996 = vmatprep.subr.bf16.mxu1 %v4315_v36  ;;  %4044 = vmatprep.subr.bf16.mxu0 %v4323_v12 }
 0x3e8   : > { %3965 = vmatmul.mubr.bf16.gmra.mxu0 %v4300_v63  ;;  %3981 = vmatmul.mubr.bf16.gmra.mxu1 %v4308_v57 }
 0x3e9   : > { %3968 = vmatprep.mubr.bf16.mxu0 %v4301_v8  ;;  %3984 = vmatprep.mubr.bf16.mxu1 %v4309_v39 }
 0x3ea   : > { %3997 = vmatpush3.bf16.msra.mxu1 %v4315_v36  ;;  %4045 = vmatpush3.bf16.msra.mxu0 %v4323_v12 }
 0x3eb   : > { %3998 = vmatprep.subr.bf16.mxu1 %v4316_v51  ;;  %4046 = vmatprep.subr.bf16.mxu0 %v4324_v13 }
 0x3ee   : > { %3999 = vmatpush3.bf16.msra.mxu1 %v4316_v51  ;;  %4047 = vmatpush3.bf16.msra.mxu0 %v4324_v13 }
 0x3ef   : > { %4000 = vmatprep.subr.bf16.mxu1 %v4317_v0  ;;  %4048 = vmatprep.subr.bf16.mxu0 %v4325_v33 }
 0x3f0   : > { %3969 = vmatmul.mubr.bf16.gmra.mxu0 %v4302_v62  ;;  %3985 = vmatmul.mubr.bf16.gmra.mxu1 %v4310_v47 }
 0x3f1   : > { %3972 = vmatprep.mubr.bf16.mxu0 %v4303_v2  ;;  %3988 = vmatprep.mubr.bf16.mxu1 %v4311_v32 }
 0x3f2   : > { %4001 = vmatpush3.bf16.msra.mxu1 %v4317_v0  ;;  %4049 = vmatpush3.bf16.msra.mxu0 %v4325_v33 }
 0x3f3   : > { %4002 = vmatprep.subr.bf16.mxu1 %v4318_v50 }
 0x3f6   : > { %4003 = vmatpush3.bf16.msra.mxu1 %v4318_v50 }
 0x3f7   : > { %4004 = vmatprep.subr.bf16.mxu1 %v4319_v7 }
 0x3f8   : > { %3973 = vmatmul.mubr.bf16.gmra.mxu0 %v4304_v5  ;;  %3989 = vmatmul.mubr.bf16.gmra.mxu1 %v4312_v6 }
 0x3fa   : > { %4005 = vmatpush3.bf16.msra.mxu1 %v4319_v7 }
 0x3fb   : > { %4006 = vmatprep.subr.bf16.mxu1 %v4320_v45 }
 0x3fe   : > { %4007 = vmatpush3.bf16.msra.mxu1 %v4320_v45 }
 0x4a0   : > { %v3962_v17 = vpop.f32.mrf.mxu0  ;;  %v5179_v10 = vpop.f32.mrf.mxu1 }
 0x4a1   : > { %v2389_v4 = vadd.f32 %v3962_v17, %v5181_v59 }
 0x4a2   : > { %v2380_v52 = vpop.f32.mrf.mxu0  ;;  %v2444_v24 = vpop.f32.mrf.mxu1 }
 0x4a3   : > { %v2381_v21 = vadd.f32 %v5181_v59, %v2380_v52  ;;  %v2509_v34 = vmax.f32 %v2389_v4, 0.0  ;;  %v2445_v5 = vadd.f32 %v5181_v59, %v2444_v24 }
 0x4a4   : > { %v3963_v18 = vpop.f32.mrf.mxu0  ;;  %v5183_v15 = vpop.f32.mrf.mxu1 }
 0x4a5   : > { %v2392_v22 = vadd.f32 %v3963_v18, %v5181_v59  ;;  %v2507_v31 = vmax.f32 %v2381_v21, 0.0  ;;  %v2523_v33 = vmax.f32 %v2445_v5, 0.0  ;;  %v5235_v5 = vld [vmem:[%s2142_s1] ss:$0 sm:$0xff] }
 0x4a6   : > { %v2383_v16 = vpop.f32.mrf.mxu0  ;;  %v2447_v25 = vpop.f32.mrf.mxu1 }
 0x4a7   : > { %v2384_v27 = vadd.f32 %v5181_v59, %v2383_v16  ;;  %v2510_v37 = vmax.f32 %v2392_v22, 0.0  ;;  %v2448_v6 = vadd.f32 %v5181_v59, %v2447_v25 }
 0x4a8   : > { %v3966_v29 = vpop.f32.mrf.mxu0  ;;  %v5189_v1 = vpop.f32.mrf.mxu1 }
 0x4a9   : > { %v2508_v20 = vmax.f32 %v2384_v27, 0.0  ;;  %v2540_v9 = vpack.c.bf16 %v2510_v37, %v2509_v34  ;;  %v2405_v3 = vadd.f32 %v3966_v29, %v5181_v59  ;;  %v2524_v52 = vmax.f32 %v2448_v6, 0.0 }
 0x4aa   : > { %v2396_v35 = vpop.f32.mrf.mxu0  ;;  %v2460_v28 = vpop.f32.mrf.mxu1  ;;  %v2453_v29 = vadd.f32 %v5179_v10, %v5181_v59  ;;  %v2469_v10 = vadd.f32 %v5189_v1, %v5181_v59 }
 0x4ab   : > { %v2539_v58 = vpack.c.bf16 %v2508_v20, %v2507_v31  ;;  %v2397_v46 = vadd.f32 %v5181_v59, %v2396_v35  ;;  %v2513_v56 = vmax.f32 %v2405_v3, 0.0  ;;  %v2547_v25 = vpack.c.bf16 %v2524_v52, %v2523_v33 }
 0x4ac   : > { %v3967_v41 = vpop.f32.mrf.mxu0  ;;  %v5191_v14 = vpop.f32.mrf.mxu1  ;;  %v2461_v27 = vadd.f32 %v5181_v59, %v2460_v28  ;;  %v2456_v20 = vadd.f32 %v5183_v15, %v5181_v59 }
 0x4ad   : > { %v2408_v48 = vadd.f32 %v3967_v41, %v5181_v59  ;;  %4008 = vmatprep.mubr.bf16.mxu1 %v2539_v58  ;;  %v2511_v44 = vmax.f32 %v2397_v46, 0.0  ;;  %v2472_v15 = vadd.f32 %v5191_v14, %v5181_v59 }
 0x4ae   : > { %v2399_v38 = vpop.f32.mrf.mxu0  ;;  %4009 = vmatmul.mubr.bf16.vlgmr.msra.gmra.mxu1 %v2540_v9  ;;  %v2463_v42 = vpop.f32.mrf.mxu1  ;;  %v2527_v35 = vmax.f32 %v2461_v27, 0.0  ;;  %v2525_v9 = vmax.f32 %v2453_v29, 0.0  ;;  %v2526_v41 = vmax.f32 %v2456_v20, 0.0 }
 0x4af   : > { %v2400_v49 = vadd.f32 %v5181_v59, %v2399_v38  ;;  %v2514_v53 = vmax.f32 %v2408_v48, 0.0  ;;  %v2464_v37 = vadd.f32 %v5181_v59, %v2463_v42  ;;  %v2529_v42 = vmax.f32 %v2469_v10, 0.0 }
 0x4b0   : > { %v3970_v23 = vpop.f32.mrf.mxu0  ;;  %v5197_v43 = vpop.f32.mrf.mxu1  ;;  %v2548_v38 = vpack.c.bf16 %v2526_v41, %v2525_v9 }
 0x4b1   : > { %v2512_v54 = vmax.f32 %v2400_v49, 0.0  ;;  %v2542_v55 = vpack.c.bf16 %v2514_v53, %v2513_v56  ;;  %v2421_v36 = vadd.f32 %v3970_v23, %v5181_v59  ;;  %v2528_v58 = vmax.f32 %v2464_v37, 0.0 }
 0x4b2   : > { %v2412_v40 = vpop.f32.mrf.mxu0  ;;  %v2476_v51 = vpop.f32.mrf.mxu1  ;;  %v2485_v1 = vadd.f32 %v5197_v43, %v5181_v59 }
 0x4b3   : > { %v2541_v19 = vpack.c.bf16 %v2512_v54, %v2511_v44  ;;  %v2413_v60 = vadd.f32 %v5181_v59, %v2412_v40  ;;  %v2517_v47 = vmax.f32 %v2421_v36, 0.0  ;;  %v2549_v48 = vpack.c.bf16 %v2528_v58, %v2527_v35 }
 0x4b4   : > { %v3971_v26 = vpop.f32.mrf.mxu0  ;;  %v3987_v45 = vpop.f32.mrf.mxu1  ;;  %v2477_v28 = vadd.f32 %v5181_v59, %v2476_v51  ;;  %v2530_v44 = vmax.f32 %v2472_v15, 0.0 }
 0x4b5   : > { %v2424_v30 = vadd.f32 %v3971_v26, %v5181_v59  ;;  %4012 = vmatprep.mubr.bf16.mxu1 %v2541_v19  ;;  %v2515_v0 = vmax.f32 %v2413_v60, 0.0  ;;  %v2488_v26 = vadd.f32 %v3987_v45, %v5181_v59 }
 0x4b6   : > { %v2415_v63 = vpop.f32.mrf.mxu0  ;;  %4013 = vmatmul.mubr.bf16.gmra.mxu1 %v2542_v55  ;;  %v2479_v24 = vpop.f32.mrf.mxu1  ;;  %v2531_v53 = vmax.f32 %v2477_v28, 0.0  ;;  %v2550_v55 = vpack.c.bf16 %v2530_v44, %v2529_v42 }
 0x4b7   : > { %v2416_v57 = vadd.f32 %v5181_v59, %v2415_v63  ;;  %v2518_v8 = vmax.f32 %v2424_v30, 0.0  ;;  %v2480_v3 = vadd.f32 %v5181_v59, %v2479_v24  ;;  %v2533_v30 = vmax.f32 %v2485_v1, 0.0 }
 0x4b8   : > { %v3974_v39 = vpop.f32.mrf.mxu0  ;;  %v3990_v34 = vpop.f32.mrf.mxu1  ;;  %v2534_v36 = vmax.f32 %v2488_v26, 0.0 }
 0x4b9   : > { %v2516_v62 = vmax.f32 %v2416_v57, 0.0  ;;  %v2544_v50 = vpack.c.bf16 %v2518_v8, %v2517_v47  ;;  %v2437_v12 = vadd.f32 %v3974_v39, %v5181_v59  ;;  %v2532_v23 = vmax.f32 %v2480_v3, 0.0  ;;  %v4327_v47 = vld [vmem:[%s5168_s19 + $0x8] sm:$0xff]  }
 0x4ba   : > { %v2428_v2 = vpop.f32.mrf.mxu0  ;;  %v2492_v46 = vpop.f32.mrf.mxu1  ;;  %v2552_v57 = vpack.c.bf16 %v2534_v36, %v2533_v30  ;;  %v2501_v8 = vadd.f32 %v3990_v34, %v5181_v59 }
 0x4bb   : > { %v2543_v32 = vpack.c.bf16 %v2516_v62, %v2515_v0  ;;  %v2429_v61 = vadd.f32 %v5181_v59, %v2428_v2  ;;  %v2521_v4 = vmax.f32 %v2437_v12, 0.0  ;;  %v2551_v56 = vpack.c.bf16 %v2532_v23, %v2531_v53  ;;  %v4326_v62 = vld [vmem:[%s5168_s19 + $0x10] sm:$0xff]   ;;  %v4328_v2 = vld [vmem:[%s5168_s19] sm:$0xff]  }
 0x4bc   : > { %v3975_v7 = vpop.f32.mrf.mxu0  ;;  %v3991_v49 = vpop.f32.mrf.mxu1  ;;  %v2493_v40 = vadd.f32 %v5181_v59, %v2492_v46  ;;  %v2537_v43 = vmax.f32 %v2501_v8, 0.0  ;;  %4050 = vmatprep.subr.bf16.mxu0 %v4326_v62 }
 0x4bd   : > { %v2440_v11 = vadd.f32 %v3975_v7, %v5181_v59  ;;  %4016 = vmatprep.mubr.bf16.mxu1 %v2543_v32  ;;  %v2519_v21 = vmax.f32 %v2429_v61, 0.0  ;;  %v2504_v39 = vadd.f32 %v3991_v49, %v5181_v59  ;;  %4051 = vmatpush3.bf16.msra.mxu0 %v4326_v62 }
 0x4be   : > { %v2431_v13 = vpop.f32.mrf.mxu0  ;;  %4017 = vmatmul.mubr.bf16.gmra.mxu1 %v2544_v50  ;;  %v2495_v54 = vpop.f32.mrf.mxu1  ;;  %v2535_v14 = vmax.f32 %v2493_v40, 0.0  ;;  %4052 = vmatprep.subr.bf16.mxu0 %v4327_v47 }
 0x4bf   : > { %v2432_v17 = vadd.f32 %v5181_v59, %v2431_v13  ;;  %v2522_v18 = vmax.f32 %v2440_v11, 0.0  ;;  %v2496_v19 = vadd.f32 %v5181_v59, %v2495_v54  ;;  %v2538_v51 = vmax.f32 %v2504_v39, 0.0 }
 0x4c1   : > { %v2520_v22 = vmax.f32 %v2432_v17, 0.0  ;;  %v2546_v31 = vpack.c.bf16 %v2522_v18, %v2521_v4  ;;  %v2536_v60 = vmax.f32 %v2496_v19, 0.0  ;;  %v2554_v0 = vpack.c.bf16 %v2538_v51, %v2537_v43  ;;  %4053 = vmatpush3.bf16.msra.mxu0 %v4327_v47 }
 0x4c2   : > { %4054 = vmatprep.subr.bf16.mxu0 %v4328_v2 }
 0x4c3   : > { %v2545_v16 = vpack.c.bf16 %v2520_v22, %v2519_v21  ;;  %v2553_v63 = vpack.c.bf16 %v2536_v60, %v2535_v14 }
 0x4c5   : > { %4020 = vmatprep.mubr.bf16.mxu1 %v2545_v16  ;;  %4055 = vmatpush3.bf16.msra.mxu0 %v4328_v2 }
 0x4c6   : > { %4021 = vmatmul.mubr.bf16.gmra.mxu1 %v2546_v31 }
 0x4c7   : > { %4024 = vmatprep.mubr.bf16.mxu1 %v2547_v25 }
 0x4ce   : > { %4025 = vmatmul.mubr.bf16.gmra.mxu1 %v2548_v38 }
 0x4cf   : > { %4028 = vmatprep.mubr.bf16.mxu1 %v2549_v48 }
 0x4d6   : > { %4029 = vmatmul.mubr.bf16.gmra.mxu1 %v2550_v55 }
 0x4d7   : > { %4032 = vmatprep.mubr.bf16.mxu1 %v2551_v56 }
 0x4de   : > { %4033 = vmatmul.mubr.bf16.gmra.mxu1 %v2552_v57 }
 0x4df   : > { %4036 = vmatprep.mubr.bf16.mxu1 %v2553_v63 }
 0x4e6   : > { %4037 = vmatmul.mubr.bf16.gmra.mxu1 %v2554_v0 }
 0x56e   : > { %v4010_v59 = vpop.f32.mrf.mxu1 }
 0x56f   : > { %v2652_v45 = vadd.f32 %v4010_v59, %v5235_v5 }
 0x570   : > { %v2643_v32 = vpop.f32.mrf.mxu1 }
 0x571   : > { %v2644_v50 = vadd.f32 %v5235_v5, %v2643_v32  ;;  %v2772_v52 = vmax.f32 %v2652_v45, 0.0 }
 0x572   : > { %v4011_v6 = vpop.f32.mrf.mxu1 }
 0x573   : > { %v2655_v7 = vadd.f32 %v4011_v6, %v5235_v5  ;;  %v2770_v33 = vmax.f32 %v2644_v50, 0.0 }
 0x574   : > { %v2646_v61 = vpop.f32.mrf.mxu1 }
 0x575   : > { %v2647_v11 = vadd.f32 %v5235_v5, %v2646_v61  ;;  %v2773_v12 = vmax.f32 %v2655_v7, 0.0 }
 0x576   : > { %v4014_v13 = vpop.f32.mrf.mxu1 }
 0x577   : > { %v2771_v17 = vmax.f32 %v2647_v11, 0.0  ;;  %v2803_v21 = vpack.c.bf16 %v2773_v12, %v2772_v52  ;;  %v2668_v25 = vadd.f32 %v4014_v13, %v5235_v5 }
 0x578   : > { %v2659_v18 = vpop.f32.mrf.mxu1 }
 0x579   : > { %v2802_v24 = vpack.c.bf16 %v2771_v17, %v2770_v33  ;;  %v2660_v4 = vadd.f32 %v5235_v5, %v2659_v18  ;;  %v2776_v35 = vmax.f32 %v2668_v25, 0.0 }
 0x57a   : > { %v4015_v22 = vpop.f32.mrf.mxu1 }
 0x57b   : > { %v2671_v16 = vadd.f32 %v4015_v22, %v5235_v5  ;;  %4056 = vmatprep.mubr.bf16.mxu0 %v2802_v24  ;;  %v2774_v20 = vmax.f32 %v2660_v4, 0.0 }
 0x57c   : > { %v2662_v27 = vpop.f32.mrf.mxu1  ;;  %4057 = vmatmul.mubr.bf16.vlgmr.msra.gmra.mxu0 %v2803_v21 }
 0x57d   : > { %v2663_v37 = vadd.f32 %v5235_v5, %v2662_v27  ;;  %v2777_v29 = vmax.f32 %v2671_v16, 0.0 }
 0x57e   : > { %v4018_v31 = vpop.f32.mrf.mxu1 }
 0x57f   : > { %v2775_v34 = vmax.f32 %v2663_v37, 0.0  ;;  %v2805_v41 = vpack.c.bf16 %v2777_v29, %v2776_v35  ;;  %v2684_v3 = vadd.f32 %v4018_v31, %v5235_v5 }
 0x580   : > { %v2675_v58 = vpop.f32.mrf.mxu1 }
 0x581   : > { %v2804_v9 = vpack.c.bf16 %v2775_v34, %v2774_v20  ;;  %v2676_v48 = vadd.f32 %v5235_v5, %v2675_v58  ;;  %v2780_v42 = vmax.f32 %v2684_v3, 0.0 }
 0x582   : > { %v4019_v46 = vpop.f32.mrf.mxu1 }
 0x583   : > { %v2687_v28 = vadd.f32 %v4019_v46, %v5235_v5  ;;  %4060 = vmatprep.mubr.bf16.mxu0 %v2804_v9  ;;  %v2778_v53 = vmax.f32 %v2676_v48, 0.0 }
 0x584   : > { %v2678_v38 = vpop.f32.mrf.mxu1  ;;  %4061 = vmatmul.mubr.bf16.gmra.mxu0 %v2805_v41 }
 0x585   : > { %v2679_v10 = vadd.f32 %v5235_v5, %v2678_v38  ;;  %v2781_v15 = vmax.f32 %v2687_v28, 0.0 }
 0x586   : > { %v4022_v49 = vpop.f32.mrf.mxu1 }
 0x587   : > { %v2779_v23 = vmax.f32 %v2679_v10, 0.0  ;;  %v2807_v56 = vpack.c.bf16 %v2781_v15, %v2780_v42  ;;  %v2700_v1 = vadd.f32 %v4022_v49, %v5235_v5 }
 0x588   : > { %v2691_v44 = vpop.f32.mrf.mxu1 }
 0x589   : > { %v2806_v54 = vpack.c.bf16 %v2779_v23, %v2778_v53  ;;  %v2692_v19 = vadd.f32 %v5235_v5, %v2691_v44  ;;  %v2784_v57 = vmax.f32 %v2700_v1, 0.0 }
 0x58a   : > { %v4023_v40 = vpop.f32.mrf.mxu1 }
 0x58b   : > { %v2703_v55 = vadd.f32 %v4023_v40, %v5235_v5  ;;  %4064 = vmatprep.mubr.bf16.mxu0 %v2806_v54  ;;  %v2782_v36 = vmax.f32 %v2692_v19, 0.0 }
 0x58c   : > { %v2694_v26 = vpop.f32.mrf.mxu1  ;;  %4065 = vmatmul.mubr.bf16.gmra.mxu0 %v2807_v56 }
 0x58d   : > { %v2695_v14 = vadd.f32 %v5235_v5, %v2694_v26  ;;  %v2785_v60 = vmax.f32 %v2703_v55, 0.0 }
 0x58e   : > { %v4026_v30 = vpop.f32.mrf.mxu1 }
 0x58f   : > { %v2783_v63 = vmax.f32 %v2695_v14, 0.0  ;;  %v2809_v43 = vpack.c.bf16 %v2785_v60, %v2784_v57  ;;  %v2716_v47 = vadd.f32 %v4026_v30, %v5235_v5  ;;  %v5273_v14 = vld [vmem:[%s2162_s14] ss:$0 sm:$0xff] }
 0x590   : > { %v2707_v8 = vpop.f32.mrf.mxu1 }
 0x591   : > { %v2808_v39 = vpack.c.bf16 %v2783_v63, %v2782_v36  ;;  %v2708_v0 = vadd.f32 %v5235_v5, %v2707_v8  ;;  %v2788_v45 = vmax.f32 %v2716_v47, 0.0 }
 0x592   : > { %v4027_v51 = vpop.f32.mrf.mxu1 }
 0x593   : > { %v2719_v62 = vadd.f32 %v4027_v51, %v5235_v5  ;;  %4068 = vmatprep.mubr.bf16.mxu0 %v2808_v39  ;;  %v2786_v50 = vmax.f32 %v2708_v0, 0.0 }
 0x594   : > { %v2710_v2 = vpop.f32.mrf.mxu1  ;;  %4069 = vmatmul.mubr.bf16.gmra.mxu0 %v2809_v43 }
 0x595   : > { %v2711_v59 = vadd.f32 %v5235_v5, %v2710_v2  ;;  %v2789_v32 = vmax.f32 %v2719_v62, 0.0 }
 0x596   : > { %v4030_v6 = vpop.f32.mrf.mxu1 }
 0x597   : > { %v2787_v7 = vmax.f32 %v2711_v59, 0.0  ;;  %v2811_v12 = vpack.c.bf16 %v2789_v32, %v2788_v45  ;;  %v2732_v52 = vadd.f32 %v4030_v6, %v5235_v5 }
 0x598   : > { %v2723_v61 = vpop.f32.mrf.mxu1 }
 0x599   : > { %v2810_v11 = vpack.c.bf16 %v2787_v7, %v2786_v50  ;;  %v2724_v33 = vadd.f32 %v5235_v5, %v2723_v61  ;;  %v2792_v25 = vmax.f32 %v2732_v52, 0.0 }
 0x59a   : > { %v4031_v13 = vpop.f32.mrf.mxu1 }
 0x59b   : > { %v2735_v17 = vadd.f32 %v4031_v13, %v5235_v5  ;;  %4072 = vmatprep.mubr.bf16.mxu0 %v2810_v11  ;;  %v2790_v4 = vmax.f32 %v2724_v33, 0.0 }
 0x59c   : > { %v2726_v18 = vpop.f32.mrf.mxu1  ;;  %4073 = vmatmul.mubr.bf16.gmra.mxu0 %v2811_v12 }
 0x59d   : > { %v2727_v24 = vadd.f32 %v5235_v5, %v2726_v18  ;;  %v2793_v21 = vmax.f32 %v2735_v17, 0.0 }
 0x59e   : > { %v4034_v22 = vpop.f32.mrf.mxu1 }
 0x59f   : > { %v2791_v16 = vmax.f32 %v2727_v24, 0.0  ;;  %v2813_v29 = vpack.c.bf16 %v2793_v21, %v2792_v25  ;;  %v2748_v35 = vadd.f32 %v4034_v22, %v5235_v5 }
 0x5a0   : > { %v2739_v27 = vpop.f32.mrf.mxu1 }
 0x5a1   : > { %v2812_v37 = vpack.c.bf16 %v2791_v16, %v2790_v4  ;;  %v2740_v20 = vadd.f32 %v5235_v5, %v2739_v27  ;;  %v2796_v3 = vmax.f32 %v2748_v35, 0.0 }
 0x5a2   : > { %v4035_v31 = vpop.f32.mrf.mxu1 }
 0x5a3   : > { %v2751_v34 = vadd.f32 %v4035_v31, %v5235_v5  ;;  %4076 = vmatprep.mubr.bf16.mxu0 %v2812_v37  ;;  %v2794_v48 = vmax.f32 %v2740_v20, 0.0 }
 0x5a4   : > { %v2742_v58 = vpop.f32.mrf.mxu1  ;;  %4077 = vmatmul.mubr.bf16.gmra.mxu0 %v2813_v29 }
 0x5a5   : > { %v2743_v9 = vadd.f32 %v5235_v5, %v2742_v58  ;;  %v2797_v41 = vmax.f32 %v2751_v34, 0.0 }
 0x5a6   : > { %v4038_v46 = vpop.f32.mrf.mxu1 }
 0x5a7   : > { %v2795_v28 = vmax.f32 %v2743_v9, 0.0  ;;  %v2815_v15 = vpack.c.bf16 %v2797_v41, %v2796_v3  ;;  %v2764_v42 = vadd.f32 %v4038_v46, %v5235_v5 }
 0x5a8   : > { %v2755_v38 = vpop.f32.mrf.mxu1 }
 0x5a9   : > { %v2814_v10 = vpack.c.bf16 %v2795_v28, %v2794_v48  ;;  %v2756_v53 = vadd.f32 %v5235_v5, %v2755_v38  ;;  %v2800_v55 = vmax.f32 %v2764_v42, 0.0 }
 0x5aa   : > { %v4039_v49 = vpop.f32.mrf.mxu1 }
 0x5ab   : > { %v2767_v23 = vadd.f32 %v4039_v49, %v5235_v5  ;;  %4080 = vmatprep.mubr.bf16.mxu0 %v2814_v10  ;;  %v2798_v40 = vmax.f32 %v2756_v53, 0.0 }
 0x5ac   : > { %v2758_v44 = vpop.f32.mrf.mxu1  ;;  %4081 = vmatmul.mubr.bf16.gmra.mxu0 %v2815_v15 }
 0x5ad   : > { %v2759_v54 = vadd.f32 %v5235_v5, %v2758_v44  ;;  %v2801_v56 = vmax.f32 %v2767_v23, 0.0 }
 0x5af   : > { %v2799_v19 = vmax.f32 %v2759_v54, 0.0  ;;  %v2817_v26 = vpack.c.bf16 %v2801_v56, %v2800_v55 }
 0x5b1   : > { %v2816_v1 = vpack.c.bf16 %v2799_v19, %v2798_v40 }
 0x5b3   : > { %4084 = vmatprep.mubr.bf16.mxu0 %v2816_v1 }
 0x5b4   : > { %4085 = vmatmul.mubr.bf16.gmra.mxu0 %v2817_v26 }
 0x63c   : > { %v4058_v60 = vpop.f32.mrf.mxu0 }
 0x63d   : > { %v5276_v30 = vadd.f32 %v4058_v60, %v5273_v14 }
 0x63e   : > { %v2906_v36 = vpop.f32.mrf.mxu0 }
 0x63f   : > { %v3035_v5 = vmax.f32 %v5276_v30, 0.0  ;;  %v5280_v63 = vadd.f32 %v5273_v14, %v2906_v36 }
 0x640   : > { %v4059_v57 = vpop.f32.mrf.mxu0 }
 0x641   : > { %3067 = vst [vmem:[#allocation2 + $0xd8] sm:$0xff] %v3035_v5  ;;  %v3033_v8 = vmax.f32 %v5280_v63, 0.0  ;;  %v5286_v39 = vadd.f32 %v4059_v57, %v5273_v14 }
 0x642   : > { %v2909_v43 = vpop.f32.mrf.mxu0 }
 0x643   : > { %3065 = vst [vmem:[#allocation2 + $0xb0] sm:$0xff] %v3033_v8  ;;  %v3036_v51 = vmax.f32 %v5286_v39, 0.0  ;;  %v5292_v0 = vadd.f32 %v5273_v14, %v2909_v43 }
 0x644   : > { %v4062_v62 = vpop.f32.mrf.mxu0 }
 0x645   : > { %3068 = vst [vmem:[#allocation2 + $0x18] sm:$0xff] %v3036_v51  ;;  %v3034_v47 = vmax.f32 %v5292_v0, 0.0  ;;  %v5298_v2 = vadd.f32 %v4062_v62, %v5273_v14 }
 0x646   : > { %v2922_v59 = vpop.f32.mrf.mxu0 }
 0x647   : > { %3066 = vst [vmem:[#allocation2] sm:$0xff] %v3034_v47  ;;  %v3039_v32 = vmax.f32 %v5298_v2, 0.0  ;;  %v5304_v6 = vadd.f32 %v5273_v14, %v2922_v59 }
 0x648   : > { %v4063_v50 = vpop.f32.mrf.mxu0 }
 0x649   : > { %3071 = vst [vmem:[#allocation2 + $0x30] sm:$0xff] %v3039_v32  ;;  %v3037_v7 = vmax.f32 %v5304_v6, 0.0  ;;  %v5310_v45 = vadd.f32 %v4063_v50, %v5273_v14 }
 0x64a   : > { %v2925_v61 = vpop.f32.mrf.mxu0 }
 0x64b   : > { %3069 = vst [vmem:[#allocation2 + $0x50] sm:$0xff] %v3037_v7  ;;  %v3040_v11 = vmax.f32 %v5310_v45, 0.0  ;;  %v5316_v12 = vadd.f32 %v5273_v14, %v2925_v61 }
 0x64c   : > { %v4066_v13 = vpop.f32.mrf.mxu0 }
 0x64d   : > { %3072 = vst [vmem:[#allocation2 + $0x48] sm:$0xff] %v3040_v11  ;;  %v3038_v33 = vmax.f32 %v5316_v12, 0.0  ;;  %v5322_v17 = vadd.f32 %v4066_v13, %v5273_v14 }
 0x64e   : > { %v2938_v52 = vpop.f32.mrf.mxu0 }
 0x64f   : > { %3070 = vst [vmem:[#allocation2 + $0x68] sm:$0xff] %v3038_v33  ;;  %v3043_v18 = vmax.f32 %v5322_v17, 0.0  ;;  %v5328_v24 = vadd.f32 %v5273_v14, %v2938_v52 }
 0x650   : > { %v4067_v21 = vpop.f32.mrf.mxu0 }
 0x651   : > { %3075 = vst [vmem:[#allocation2 + $0xe8] sm:$0xff] %v3043_v18  ;;  %v3041_v22 = vmax.f32 %v5328_v24, 0.0  ;;  %v5334_v4 = vadd.f32 %v4067_v21, %v5273_v14 }
 0x652   : > { %v2941_v16 = vpop.f32.mrf.mxu0 }
 0x653   : > { %3073 = vst [vmem:[#allocation2 + $0x80] sm:$0xff] %v3041_v22  ;;  %v3044_v25 = vmax.f32 %v5334_v4, 0.0  ;;  %v5340_v27 = vadd.f32 %v5273_v14, %v2941_v16 }
 0x654   : > { %v4070_v37 = vpop.f32.mrf.mxu0 }
 0x655   : > { %3076 = vst [vmem:[#allocation2 + $0xb8] sm:$0xff] %v3044_v25  ;;  %v3042_v29 = vmax.f32 %v5340_v27, 0.0  ;;  %v5346_v31 = vadd.f32 %v4070_v37, %v5273_v14 }
 0x656   : > { %v2954_v20 = vpop.f32.mrf.mxu0 }
 0x657   : > { %3074 = vst [vmem:[#allocation2 + $0x88] sm:$0xff] %v3042_v29  ;;  %v3047_v34 = vmax.f32 %v5346_v31, 0.0  ;;  %v5352_v35 = vadd.f32 %v5273_v14, %v2954_v20 }
 0x658   : > { %v4071_v58 = vpop.f32.mrf.mxu0 }
 0x659   : > { %3079 = vst [vmem:[#allocation2 + $0x8] sm:$0xff] %v3047_v34  ;;  %v3045_v9 = vmax.f32 %v5352_v35, 0.0  ;;  %v5358_v41 = vadd.f32 %v4071_v58, %v5273_v14 }
 0x65a   : > { %v2957_v46 = vpop.f32.mrf.mxu0 }
 0x65b   : > { %3077 = vst [vmem:[#allocation2 + $0x60] sm:$0xff] %v3045_v9  ;;  %v3048_v48 = vmax.f32 %v5358_v41, 0.0  ;;  %v5364_v28 = vadd.f32 %v5273_v14, %v2957_v46 }
 0x65c   : > { %v4074_v3 = vpop.f32.mrf.mxu0 }
 0x65d   : > { %3080 = vst [vmem:[#allocation2 + $0x78] sm:$0xff] %v3048_v48  ;;  %v3046_v38 = vmax.f32 %v5364_v28, 0.0  ;;  %v5370_v10 = vadd.f32 %v4074_v3, %v5273_v14 }
 0x65e   : > { %v2970_v15 = vpop.f32.mrf.mxu0 }
 0x65f   : > { %3078 = vst [vmem:[#allocation2 + $0xf0] sm:$0xff] %v3046_v38  ;;  %v3051_v49 = vmax.f32 %v5370_v10, 0.0  ;;  %v5376_v53 = vadd.f32 %v5273_v14, %v2970_v15 }
 0x660   : > { %v4075_v23 = vpop.f32.mrf.mxu0 }
 0x661   : > { %3083 = vst [vmem:[#allocation2 + $0x40] sm:$0xff] %v3051_v49  ;;  %v3049_v42 = vmax.f32 %v5376_v53, 0.0  ;;  %v5382_v44 = vadd.f32 %v4075_v23, %v5273_v14 }
 0x662   : > { %v2973_v54 = vpop.f32.mrf.mxu0 }
 0x663   : > { %3081 = vst [vmem:[#allocation2 + $0x38] sm:$0xff] %v3049_v42  ;;  %v3052_v56 = vmax.f32 %v5382_v44, 0.0  ;;  %v5388_v40 = vadd.f32 %v5273_v14, %v2973_v54 }
 0x664   : > { %v4078_v19 = vpop.f32.mrf.mxu0 }
 0x665   : > { %3084 = vst [vmem:[#allocation2 + $0xc8] sm:$0xff] %v3052_v56  ;;  %v3050_v55 = vmax.f32 %v5388_v40, 0.0  ;;  %v5394_v1 = vadd.f32 %v4078_v19, %v5273_v14 }
 0x666   : > { %v2986_v26 = vpop.f32.mrf.mxu0 }
 0x667   : > { %3082 = vst [vmem:[#allocation2 + $0x58] sm:$0xff] %v3050_v55  ;;  %v3055_v60 = vmax.f32 %v5394_v1, 0.0  ;;  %v5400_v36 = vadd.f32 %v5273_v14, %v2986_v26 }
 0x668   : > { %v4079_v57 = vpop.f32.mrf.mxu0 }
 0x669   : > { %3087 = vst [vmem:[#allocation2 + $0x70] sm:$0xff] %v3055_v60  ;;  %v3053_v43 = vmax.f32 %v5400_v36, 0.0  ;;  %v5406_v62 = vadd.f32 %v4079_v57, %v5273_v14 }
 0x66a   : > { %v2989_v59 = vpop.f32.mrf.mxu0 }
 0x66b   : > { %3085 = vst [vmem:[#allocation2 + $0xe0] sm:$0xff] %v3053_v43  ;;  %v3056_v50 = vmax.f32 %v5406_v62, 0.0  ;;  %v2990_v61 = vadd.f32 %v5273_v14, %v2989_v59 }
 0x66c   : > { %v4082_v13 = vpop.f32.mrf.mxu0 }
 0x66d   : > { %3088 = vst [vmem:[#allocation2 + $0xc0] sm:$0xff] %v3056_v50  ;;  %v3054_v52 = vmax.f32 %v2990_v61, 0.0  ;;  %v3011_v21 = vadd.f32 %v4082_v13, %v5273_v14 }
 0x66e   : > { %v3002_v16 = vpop.f32.mrf.mxu0 }
 0x66f   : > { %3086 = vst [vmem:[#allocation2 + $0x90] sm:$0xff] %v3054_v52  ;;  %v3059_v37 = vmax.f32 %v3011_v21, 0.0  ;;  %v3003_v20 = vadd.f32 %v5273_v14, %v3002_v16 }
 0x670   : > { %v4083_v58 = vpop.f32.mrf.mxu0 }
 0x671   : > { %3091 = vst [vmem:[#allocation2 + $0x10] sm:$0xff] %v3059_v37  ;;  %v3057_v46 = vmax.f32 %v3003_v20, 0.0  ;;  %v3014_v3 = vadd.f32 %v4083_v58, %v5273_v14 }
 0x672   : > { %v3005_v15 = vpop.f32.mrf.mxu0 }
 0x673   : > { %3089 = vst [vmem:[#allocation2 + $0xa8] sm:$0xff] %v3057_v46  ;;  %v3060_v23 = vmax.f32 %v3014_v3, 0.0  ;;  %v3006_v54 = vadd.f32 %v5273_v14, %v3005_v15 }
 0x674   : > { %v4086_v19 = vpop.f32.mrf.mxu0 }
 0x675   : > { %3092 = vst [vmem:[#allocation2 + $0x28] sm:$0xff] %v3060_v23  ;;  %v3058_v26 = vmax.f32 %v3006_v54, 0.0  ;;  %v3027_v36 = vadd.f32 %v4086_v19, %v5273_v14 }
 0x676   : > { %v3018_v57 = vpop.f32.mrf.mxu0 }
 0x677   : > { %3090 = vst [vmem:[#allocation2 + $0xd0] sm:$0xff] %v3058_v26  ;;  %v3063_v62 = vmax.f32 %v3027_v36, 0.0  ;;  %v3019_v59 = vadd.f32 %v5273_v14, %v3018_v57 }
 0x678   : > { %v4087_v61 = vpop.f32.mrf.mxu0 }
 0x679   : > { %3095 = vst [vmem:[#allocation2 + $0x20] sm:$0xff] %v3063_v62  ;;  %v3061_v13 = vmax.f32 %v3019_v59, 0.0  ;;  %v3030_v21 = vadd.f32 %v4087_v61, %v5273_v14 }
 0x67a   : > { %v3021_v16 = vpop.f32.mrf.mxu0 }
 0x67b   : > { %3093 = vst [vmem:[#allocation2 + $0xa0] sm:$0xff] %v3061_v13  ;;  %v3064_v20 = vmax.f32 %v3030_v21, 0.0  ;;  %v3022_v58 = vadd.f32 %v5273_v14, %v3021_v16  ;;  %3100 = sbr.rel (%p3466_p9) target bundleno = 1680 (0x690), region = 120 }
 0x67d   : > { %3096 = vst [vmem:[#allocation2 + $0x98] sm:$0xff] %v3064_v20  ;;  %v3062_v3 = vmax.f32 %v3022_v58, 0.0 }
 0x67f   : > { %3094 = vst [vmem:[#allocation2 + $0xf8] sm:$0xff] %v3062_v3 }
 0x680   : > { %3101 = vst [vmem:[#allocation20] sm:$0xff] %v3033_v8  ;;  %3102 = vst [vmem:[#allocation20 + $0x8] sm:$0xff] %v3034_v47 }
 0x681   : > { %3103 = vst [vmem:[#allocation20 + $0x10] sm:$0xff] %v3035_v5  ;;  %3104 = vst [vmem:[#allocation20 + $0x18] sm:$0xff] %v3036_v51 }
 0x682   : > { %3105 = vst [vmem:[#allocation20 + $0x20] sm:$0xff] %v3037_v7  ;;  %3106 = vst [vmem:[#allocation20 + $0x28] sm:$0xff] %v3038_v33 }
 0x683   : > { %3107 = vst [vmem:[#allocation20 + $0x30] sm:$0xff] %v3039_v32  ;;  %3108 = vst [vmem:[#allocation20 + $0x38] sm:$0xff] %v3040_v11 }
 0x684   : > { %3109 = vst [vmem:[#allocation20 + $0x40] sm:$0xff] %v3041_v22  ;;  %3110 = vst [vmem:[#allocation20 + $0x48] sm:$0xff] %v3042_v29 }
 0x685   : > { %3111 = vst [vmem:[#allocation20 + $0x50] sm:$0xff] %v3043_v18  ;;  %3112 = vst [vmem:[#allocation20 + $0x58] sm:$0xff] %v3044_v25 }
 0x686   : > { %3113 = vst [vmem:[#allocation20 + $0x60] sm:$0xff] %v3045_v9  ;;  %3114 = vst [vmem:[#allocation20 + $0x68] sm:$0xff] %v3046_v38 }
 0x687   : > { %3115 = vst [vmem:[#allocation20 + $0x70] sm:$0xff] %v3047_v34  ;;  %3116 = vst [vmem:[#allocation20 + $0x78] sm:$0xff] %v3048_v48 }
 0x688   : > { %3117 = vst [vmem:[#allocation20 + $0x80] sm:$0xff] %v3049_v42  ;;  %3118 = vst [vmem:[#allocation20 + $0x88] sm:$0xff] %v3050_v55 }
 0x689   : > { %3119 = vst [vmem:[#allocation20 + $0x90] sm:$0xff] %v3051_v49  ;;  %3120 = vst [vmem:[#allocation20 + $0x98] sm:$0xff] %v3052_v56 }
 0x68a   : > { %3121 = vst [vmem:[#allocation20 + $0xa0] sm:$0xff] %v3053_v43  ;;  %3122 = vst [vmem:[#allocation20 + $0xa8] sm:$0xff] %v3054_v52 }
 0x68b   : > { %3123 = vst [vmem:[#allocation20 + $0xb0] sm:$0xff] %v3055_v60  ;;  %3124 = vst [vmem:[#allocation20 + $0xb8] sm:$0xff] %v3056_v50 }
 0x68c   : > { %3125 = vst [vmem:[#allocation20 + $0xc0] sm:$0xff] %v3057_v46  ;;  %3126 = vst [vmem:[#allocation20 + $0xc8] sm:$0xff] %v3058_v26 }
 0x68d   : > { %3127 = vst [vmem:[#allocation20 + $0xd0] sm:$0xff] %v3059_v37  ;;  %3128 = vst [vmem:[#allocation20 + $0xd8] sm:$0xff] %v3060_v23 }
 0x68e   : > { %3129 = vst [vmem:[#allocation20 + $0xe0] sm:$0xff] %v3061_v13  ;;  %3130 = vst [vmem:[#allocation20 + $0xe8] sm:$0xff] %v3062_v3 }
 0x68f   : > { %3131 = vst [vmem:[#allocation20 + $0xf0] sm:$0xff] %v3063_v62  ;;  %3132 = vst [vmem:[#allocation20 + $0xf8] sm:$0xff] %v3064_v20 }
 0x690 PF: > { %s5516_s25 = sadd.s32 4294967295, %s4633_s27   ;;  %s4649_s16 = smov [#allocation20]  }
 0x691   : > { %p5463_p10 = scmp.eq.s32.totalorder %s5516_s25, 2  ;;  %s3142_s21 = sshll.u32 %s4649_s16, 4  ;;  %s3143_s21 = int_to_ptr.vmem [resolvable:$true] %s3142_s21 }
 0x692   : > { %s4563_s28 = scalar_lea.vmem %s3143_s21, 4096  ;;  %p4570_p0 = scmp.lt.s32.totalorder %s3143_s21, %s3143_s21 }
 0x693   : > { %p4564_p11 = scmp.ne.s32.totalorder %s3143_s21, %s4563_s28  ;;  %p4571_p2 = scmp.lt.s32.totalorder %s4563_s28, %s4563_s28 }
 0x695   : > { %p4565_p12 = pnand %p4564_p11, %p5463_p10  ;;  %p4572_p3 = por %p4571_p2, %p4570_p0 }
 0x697   : > { %p4566_p13 = pneg %p4565_p12 }
 0x699   : > { %p4573_p1 = pnand %p4572_p3, %p4566_p13 }
 0x69b   : > { %4576 = shalt.err (!%p4573_p1)
}
 0x69c   : > { %s4650_s19 = smov 128   ;;  %s4651_s22 = smov 8  }
 0x69d   : > { %4141 = dma.vmem_to_hbm [thread:$0]  (%p5463_p10), %s3143_s21, 4096, %s5500_s13, [#allocation7], %s4650_s19, %s4650_s19, %s4651_s22  }
 0x69e   : > { %4620 = dma.done.wait (%p5463_p10), [#allocation7], 4096  }
 0x69f   : > { %4622 = vsyncadd (%p5463_p10), [#allocation7], 4294963200 }
 0x6a0 PF: > { %s29_s27 = sadd.s32 1, %s4633_s27   ;;  %s5518_s25 = smov %s4629_s26 }
 0x6a1   : > { %p26_p4 = scmp.ge.s32.totalorder %s29_s27, 5   ;;  %s5519_s26 = smov %s5521_s17 }
 0x6a3   :  { %28 = sbr.rel (!%p26_p4) target bundleno = 9 (0x9), region = 153 }
 0x6a8   :  { %3158 = vsyncpa [#allocation6], 1 }
 0x6a9   :  { %3160 = vsyncpa [#allocation6 + $0x1], 1 }
 0x6aa   :  { %3161 = vsyncpa [#allocation9], 1 }
 0x6ab   :  { %3162 = vsyncpa [#allocation12], 1 }
 0x6ac   :  { %3163 = vsyncpa [#allocation15], 1 }
 0x6ad   :  { %3164 = vsyncpa [#allocation18], 1 }
 0x6ae   :  { %3165 = vsyncpa [#allocation7], 1 }
 0x6af   :  { %3167 = vsyncpa [#allocation7 + $0x1], 1 }

</bundles_post_ra>
